<compile_context>
chip_gen: v6e
topology: v6e:2x2x1
jax: 0.10.0
libtpu: 0.0.40
codegen_flags: <defaults>
</compile_context>

<pallas_src>
import jax
import jax.numpy as jnp
from jax.experimental import pallas as pl
from jax.experimental.pallas import tpu as pltpu  # noqa: F401  (no scratch needed anymore)

T, B, F = 8, 2, 16          # seq_len, batch, features
BP = 8                      # batch padded to one full sublane group
H = 32                      # hidden_size
G = 4 * H                   # 128 gate lanes per layer (i, f, g, o)
NUM_LAYERS = 2
NUM_CLASSES = 5
OUT_W = 128                 # lane-dense classifier width; sliced to NUM_CLASSES in wrapper
EPS = 1e-5

# -------- packed parameter buffer layout: (PR, 2*G) float32, all offsets static & 8-aligned
ROW_LN_G = 0                # ln gamma in cols 0:F
ROW_LN_B = 1                # ln beta  in cols 0:F
ROW_B01 = 2                 # b0 in cols 0:G, b1 in cols G:2G
ROW_CLS_B = 3               # classifier bias in cols 0:OUT_W (zero-padded)
ROW_WIH0 = 8                # rows 8..23  : Wih0^T (F, G) in cols 0:G
ROW_WBOTH = 24              # rows 24..87 : [[Whh0 | Wih1], [0 | Whh1]]  (2H, 2G)
ROW_CLSW = 88               # rows 88..119: classifier weight padded (H, OUT_W) in cols 0:OUT_W
PR = 120                    # total rows (multiple of 8)


# ------------------------------------------------------------ fused kernel
def fused_lstm_kernel(x_ref, p_ref, out_ref):
    # ---- unpack packed params (one-time VMEM reads, static offsets) ----
    ln_g = p_ref[ROW_LN_G:ROW_LN_G + 1, 0:F]            # (1, F)
    ln_b = p_ref[ROW_LN_B:ROW_LN_B + 1, 0:F]            # (1, F)
    b0 = p_ref[ROW_B01:ROW_B01 + 1, 0:G]                # (1, G)
    b1 = p_ref[ROW_B01:ROW_B01 + 1, G:2 * G]            # (1, G)
    cls_b = p_ref[ROW_CLS_B:ROW_CLS_B + 1, 0:OUT_W]     # (1, OUT_W)
    wih0 = p_ref[ROW_WIH0:ROW_WIH0 + F, 0:G]            # (F, G)
    w_both = p_ref[ROW_WBOTH:ROW_WBOTH + 2 * H, :]      # (2H, 2G)
    cls_w = p_ref[ROW_CLSW:ROW_CLSW + H, 0:OUT_W]       # (H, OUT_W)

    # ---- LayerNorm over the feature axis (rows are flattened (t, b) pairs) ----
    x = x_ref[...]                                       # (T*BP, F)
    mean = jnp.mean(x, axis=-1, keepdims=True)
    var = jnp.mean((x - mean) ** 2, axis=-1, keepdims=True)
    xn = (x - mean) * jax.lax.rsqrt(var + EPS) * ln_g + ln_b

    # ---- hoisted layer-0 input projection (+ bias), one MXU push ----
    xproj0 = jnp.dot(xn, wih0, preferred_element_type=jnp.float32) + b0   # (T*BP, G)

    # hoisted broadcasts / masks (keep them out of the unrolled loop)
    b1_b = jnp.broadcast_to(b1, (BP, G))
    lane = jax.lax.broadcasted_iota(jnp.int32, (BP, G), 1)
    g_mask = (lane >= 2 * H) & (lane < 3 * H)            # tanh lanes of the g gate

    def activate(gates):
        # one full-tile tanh + one full-tile sigmoid (2 EUP pushes), lane-selected
        return jnp.where(g_mask, jnp.tanh(gates), jax.nn.sigmoid(gates))

    def cell_update(act, c):
        i_g = act[:, 0 * H:1 * H]
        f_g = act[:, 1 * H:2 * H]
        g_g = act[:, 2 * H:3 * H]
        o_g = act[:, 3 * H:4 * H]
        c_new = f_g * c + i_g * g_g
        h_new = o_g * jnp.tanh(c_new)
        return h_new, c_new

    zeros = jnp.zeros((BP, H), jnp.float32)
    h0, c0 = zeros, zeros
    h1, c1 = zeros, zeros

    # ---- wavefront recurrence: stage s = layer-0 step s + layer-1 step s-1 ----
    for s in range(T + 1):                               # fully unrolled (T+1 = 9 stages)
        if s == 0:
            # h0, h1 are zero -> recurrent matmul contributes nothing; skip it.
            act0 = activate(xproj0[0:BP, :])
            h0, c0 = cell_update(act0, c0)
        else:
            # h0 == h0[s-1], h1 == h1[s-2]: one fused MXU push for both layers.
            lhs = jnp.concatenate([h0, h1], axis=-1)     # (BP, 2H)
            gboth = jnp.dot(lhs, w_both,
                            preferred_element_type=jnp.float32)   # (BP, 2G)
            # layer-1 step s-1: input h0[s-1], hidden h1[s-2]
            act1 = activate(gboth[:, G:2 * G] + b1_b)
            h1, c1 = cell_update(act1, c1)
            # layer-0 step s (skipped at the drain stage s == T)
            if s < T:
                act0 = activate(xproj0[s * BP:(s + 1) * BP, :] + gboth[:, 0:G])
                h0, c0 = cell_update(act0, c0)

    # ---- classifier on hn = stack of final hidden states (layer0, layer1) ----
    hn = jnp.concatenate([h0, h1], axis=0)               # (NUM_LAYERS*BP, H)
    out_ref[...] = (jnp.dot(hn, cls_w, preferred_element_type=jnp.float32) + cls_b)


# ---------------------------------------------------------------- wrapper
@jax.jit
def model_forward(x, packed):
    # pad batch to one full sublane group; padded rows are garbage, sliced off below
    x_p = jnp.zeros((T, BP, F), jnp.float32).at[:, :B, :].set(x)
    x_flat = x_p.reshape(T * BP, F)
    out = pl.pallas_call(
        fused_lstm_kernel,
        in_specs=[
            pl.BlockSpec((T * BP, F), lambda: (0, 0)),        # x (flattened, padded)
            pl.BlockSpec((PR, 2 * G), lambda: (0, 0)),        # single packed param buffer
        ],
        out_specs=pl.BlockSpec((NUM_LAYERS * BP, OUT_W), lambda: (0, 0)),
        out_shape=jax.ShapeDtypeStruct((NUM_LAYERS * BP, OUT_W), jnp.float32),
    )(x_flat, packed)
    # matches torch classifier(hn): (num_layers, batch, num_classes)
    return out.reshape(NUM_LAYERS, BP, OUT_W)[:, :B, :NUM_CLASSES]


# ---------------------------------------------------------------- params
def init_params(key):
    bound = 1.0 / jnp.sqrt(H)
    params = {
        "ln_g": jnp.ones((F,), jnp.float32),
        "ln_b": jnp.zeros((F,), jnp.float32),
    }
    for l in range(NUM_LAYERS):
        in_dim = F if l == 0 else H
        key, k1, k2, k3, k4 = jax.random.split(key, 5)
        wih = jax.random.uniform(k1, (4 * H, in_dim), jnp.float32, -bound, bound)
        whh = jax.random.uniform(k2, (4 * H, H), jnp.float32, -bound, bound)
        bih = jax.random.uniform(k3, (4 * H,), jnp.float32, -bound, bound)
        bhh = jax.random.uniform(k4, (4 * H,), jnp.float32, -bound, bound)
        params[f"wih{l}_t"] = wih.T                      # (in_dim, 4H)
        params[f"whh{l}_t"] = whh.T                      # (H, 4H)
        params[f"b{l}"] = (bih + bhh).reshape(1, 4 * H)  # combined bias
    key, k1, k2 = jax.random.split(key, 3)
    cbound = 1.0 / jnp.sqrt(H)
    params["cls_w_t"] = jax.random.uniform(k1, (H, NUM_CLASSES), jnp.float32,
                                           -cbound, cbound)
    params["cls_b"] = jax.random.uniform(k2, (NUM_CLASSES,), jnp.float32,
                                         -cbound, cbound)
    return params


def pack_params(params):
    """Pack every parameter into one contiguous, 8/128-aligned f32 buffer."""
    P = jnp.zeros((PR, 2 * G), jnp.float32)
    P = P.at[ROW_LN_G, 0:F].set(params["ln_g"])
    P = P.at[ROW_LN_B, 0:F].set(params["ln_b"])
    P = P.at[ROW_B01, 0:G].set(params["b0"][0])
    P = P.at[ROW_B01, G:2 * G].set(params["b1"][0])
    P = P.at[ROW_CLS_B, 0:NUM_CLASSES].set(params["cls_b"])
    P = P.at[ROW_WIH0:ROW_WIH0 + F, 0:G].set(params["wih0_t"])
    # block matrix [[Whh0 | Wih1], [0 | Whh1]] for the fused per-stage matmul
    P = P.at[ROW_WBOTH:ROW_WBOTH + H, 0:G].set(params["whh0_t"])
    P = P.at[ROW_WBOTH:ROW_WBOTH + H, G:2 * G].set(params["wih1_t"])
    P = P.at[ROW_WBOTH + H:ROW_WBOTH + 2 * H, G:2 * G].set(params["whh1_t"])
    P = P.at[ROW_CLSW:ROW_CLSW + H, 0:NUM_CLASSES].set(params["cls_w_t"])
    return P


# ---------------------------------------------------------------- pure-JAX reference
def reference_forward(x, params):
    mean = x.mean(-1, keepdims=True)
    var = ((x - mean) ** 2).mean(-1, keepdims=True)
    xn = (x - mean) / jnp.sqrt(var + EPS) * params["ln_g"] + params["ln_b"]
    inp = xn
    hn_list = []
    for l in range(NUM_LAYERS):
        wih_t, whh_t, bias = params[f"wih{l}_t"], params[f"whh{l}_t"], params[f"b{l}"]
        h = jnp.zeros((B, H), jnp.float32)
        c = jnp.zeros((B, H), jnp.float32)
        outs = []
        for t in range(T):
            gates = inp[t] @ wih_t + h @ whh_t + bias
            i_g = jax.nn.sigmoid(gates[:, 0 * H:1 * H])
            f_g = jax.nn.sigmoid(gates[:, 1 * H:2 * H])
            g_g = jnp.tanh(gates[:, 2 * H:3 * H])
            o_g = jax.nn.sigmoid(gates[:, 3 * H:4 * H])
            c = f_g * c + i_g * g_g
            h = o_g * jnp.tanh(c)
            outs.append(h)
        hn_list.append(h)
        inp = jnp.stack(outs, axis=0)
    hn = jnp.stack(hn_list, axis=0)
    logits = hn.reshape(NUM_LAYERS * B, H) @ params["cls_w_t"] + params["cls_b"]
    return logits.reshape(NUM_LAYERS, B, NUM_CLASSES)


if __name__ == "__main__":
    key = jax.random.PRNGKey(0)
    key, kx = jax.random.split(key)
    x = jax.random.normal(kx, (T, B, F), jnp.float32)
    params = init_params(key)
    packed = pack_params(params)

    out = model_forward(x, packed)
    out = jax.block_until_ready(out)

    ref = reference_forward(x, params)
    assert out.shape == (NUM_LAYERS, B, NUM_CLASSES), out.shape
    assert jnp.allclose(out, ref, atol=1e-4, rtol=1e-4), float(jnp.max(jnp.abs(out - ref)))

    print("KERNEL_OK")
</pallas_src>

<mosaic_0001>
module attributes {stable_mosaic.version = 11 : i64} {
  func.func @fused_lstm_kernel(%arg0: memref<64x16xf32, #tpu.memory_space<vmem>>, %arg1: memref<120x256xf32, #tpu.memory_space<vmem>>, %arg2: memref<16x128xf32, #tpu.memory_space<vmem>>) attributes {dimension_semantics = [], scalar_prefetch = 0 : i64, scratch_operands = 0 : i64, tpu.core_type = #tpu.core_type<tc>} {
    %c0 = arith.constant 0 : index
    %c0_0 = arith.constant 0 : index
    %0 = vector.load %arg1[%c0, %c0_0] : memref<120x256xf32, #tpu.memory_space<vmem>>, vector<1x16xf32>
    %c1 = arith.constant 1 : index
    %c0_1 = arith.constant 0 : index
    %1 = vector.load %arg1[%c1, %c0_1] : memref<120x256xf32, #tpu.memory_space<vmem>>, vector<1x16xf32>
    %c2 = arith.constant 2 : index
    %c0_2 = arith.constant 0 : index
    %2 = vector.load %arg1[%c2, %c0_2] : memref<120x256xf32, #tpu.memory_space<vmem>>, vector<1x128xf32>
    %c2_3 = arith.constant 2 : index
    %c128 = arith.constant 128 : index
    %3 = vector.load %arg1[%c2_3, %c128] : memref<120x256xf32, #tpu.memory_space<vmem>>, vector<1x128xf32>
    %c3 = arith.constant 3 : index
    %c0_4 = arith.constant 0 : index
    %4 = vector.load %arg1[%c3, %c0_4] : memref<120x256xf32, #tpu.memory_space<vmem>>, vector<1x128xf32>
    %c8 = arith.constant 8 : index
    %c0_5 = arith.constant 0 : index
    %5 = vector.load %arg1[%c8, %c0_5] : memref<120x256xf32, #tpu.memory_space<vmem>>, vector<16x128xf32>
    %c24 = arith.constant 24 : index
    %c0_6 = arith.constant 0 : index
    %6 = vector.load %arg1[%c24, %c0_6] : memref<120x256xf32, #tpu.memory_space<vmem>>, vector<64x256xf32>
    %c88 = arith.constant 88 : index
    %c0_7 = arith.constant 0 : index
    %7 = vector.load %arg1[%c88, %c0_7] : memref<120x256xf32, #tpu.memory_space<vmem>>, vector<32x128xf32>
    %c0_8 = arith.constant 0 : index
    %c0_9 = arith.constant 0 : index
    %8 = vector.load %arg0[%c0_8, %c0_9] : memref<64x16xf32, #tpu.memory_space<vmem>>, vector<64x16xf32>
    %cst = arith.constant dense<0.000000e+00> : vector<64xf32>
    %9 = vector.multi_reduction <add>, %8, %cst [1] : vector<64x16xf32> to vector<64xf32>
    %10 = vector.shape_cast %9 : vector<64xf32> to vector<64x1xf32>
    %cst_10 = arith.constant 1.600000e+01 : f32
    %11 = vector.broadcast %cst_10 : f32 to vector<64x1xf32>
    %12 = arith.divf %10, %11 : vector<64x1xf32>
    %13 = vector.broadcast %12 : vector<64x1xf32> to vector<64x16xf32>
    %14 = arith.subf %8, %13 : vector<64x16xf32>
    %15 = arith.mulf %14, %14 : vector<64x16xf32>
    %cst_11 = arith.constant dense<0.000000e+00> : vector<64xf32>
    %16 = vector.multi_reduction <add>, %15, %cst_11 [1] : vector<64x16xf32> to vector<64xf32>
    %17 = vector.shape_cast %16 : vector<64xf32> to vector<64x1xf32>
    %cst_12 = arith.constant 1.600000e+01 : f32
    %18 = vector.broadcast %cst_12 : f32 to vector<64x1xf32>
    %19 = arith.divf %17, %18 : vector<64x1xf32>
    %20 = vector.broadcast %12 : vector<64x1xf32> to vector<64x16xf32>
    %21 = arith.subf %8, %20 : vector<64x16xf32>
    %cst_13 = arith.constant 9.99999974E-6 : f32
    %22 = vector.broadcast %cst_13 : f32 to vector<64x1xf32>
    %23 = arith.addf %19, %22 : vector<64x1xf32>
    %24 = math.rsqrt %23 : vector<64x1xf32>
    %25 = vector.broadcast %24 : vector<64x1xf32> to vector<64x16xf32>
    %26 = arith.mulf %21, %25 : vector<64x16xf32>
    %27 = vector.broadcast %0 : vector<1x16xf32> to vector<64x16xf32>
    %28 = arith.mulf %26, %27 : vector<64x16xf32>
    %29 = vector.broadcast %1 : vector<1x16xf32> to vector<64x16xf32>
    %30 = arith.addf %28, %29 : vector<64x16xf32>
    %cst_14 = arith.constant dense<0.000000e+00> : vector<64x128xf32>
    %31 = tpu.matmul %30, %5, %cst_14 {dimension_numbers = #tpu.dot_dimension_numbers<[1], [0], [0], [1], [0, 0, 1, 1], [], []>} : vector<64x16xf32>, vector<16x128xf32>, vector<64x128xf32> -> vector<64x128xf32>
    %32 = vector.broadcast %2 : vector<1x128xf32> to vector<64x128xf32>
    %33 = arith.addf %31, %32 : vector<64x128xf32>
    %34 = vector.shape_cast %3 : vector<1x128xf32> to vector<1x128xf32>
    %35 = vector.broadcast %34 : vector<1x128xf32> to vector<8x128xf32>
    %36 = tpu.iota {dimensions = array<i32: 1>} : vector<8x128xi32>
    %c64_i32 = arith.constant 64 : i32
    %37 = vector.broadcast %c64_i32 : i32 to vector<8x128xi32>
    %38 = arith.cmpi sge, %36, %37 : vector<8x128xi32>
    %c96_i32 = arith.constant 96 : i32
    %39 = vector.broadcast %c96_i32 : i32 to vector<8x128xi32>
    %40 = arith.cmpi slt, %36, %39 : vector<8x128xi32>
    %41 = arith.andi %38, %40 : vector<8x128xi1>
    %cst_15 = arith.constant 0.000000e+00 : f32
    %42 = vector.broadcast %cst_15 : f32 to vector<8x32xf32>
    %43 = vector.extract_strided_slice %33 {offsets = [0, 0], sizes = [8, 128], strides = [1, 1]} : vector<64x128xf32> to vector<8x128xf32>
    %44 = math.tanh %43 : vector<8x128xf32>
    %45 = arith.negf %43 : vector<8x128xf32>
    %46 = math.exp %45 : vector<8x128xf32>
    %cst_16 = arith.constant 1.000000e+00 : f32
    %47 = vector.broadcast %cst_16 : f32 to vector<8x128xf32>
    %48 = arith.addf %47, %46 : vector<8x128xf32>
    %49 = arith.divf %47, %48 : vector<8x128xf32>
    %50 = arith.select %41, %44, %49 : vector<8x128xi1>, vector<8x128xf32>
    %51 = vector.extract_strided_slice %50 {offsets = [0, 0], sizes = [8, 32], strides = [1, 1]} : vector<8x128xf32> to vector<8x32xf32>
    %52 = vector.extract_strided_slice %50 {offsets = [0, 32], sizes = [8, 32], strides = [1, 1]} : vector<8x128xf32> to vector<8x32xf32>
    %53 = vector.extract_strided_slice %50 {offsets = [0, 64], sizes = [8, 32], strides = [1, 1]} : vector<8x128xf32> to vector<8x32xf32>
    %54 = vector.extract_strided_slice %50 {offsets = [0, 96], sizes = [8, 32], strides = [1, 1]} : vector<8x128xf32> to vector<8x32xf32>
    %55 = arith.mulf %52, %42 : vector<8x32xf32>
    %56 = arith.mulf %51, %53 : vector<8x32xf32>
    %57 = arith.addf %55, %56 : vector<8x32xf32>
    %58 = math.tanh %57 : vector<8x32xf32>
    %59 = arith.mulf %54, %58 : vector<8x32xf32>
    %60 = tpu.concatenate %59, %42 in 1 : vector<8x32xf32>, vector<8x32xf32> -> vector<8x64xf32>
    %cst_17 = arith.constant dense<0.000000e+00> : vector<8x256xf32>
    %61 = tpu.matmul %60, %6, %cst_17 {dimension_numbers = #tpu.dot_dimension_numbers<[1], [0], [0], [1], [0, 0, 1, 1], [], []>} : vector<8x64xf32>, vector<64x256xf32>, vector<8x256xf32> -> vector<8x256xf32>
    %62 = vector.extract_strided_slice %61 {offsets = [0, 128], sizes = [8, 128], strides = [1, 1]} : vector<8x256xf32> to vector<8x128xf32>
    %63 = arith.addf %62, %35 : vector<8x128xf32>
    %64 = math.tanh %63 : vector<8x128xf32>
    %65 = arith.negf %63 : vector<8x128xf32>
    %66 = math.exp %65 : vector<8x128xf32>
    %cst_18 = arith.constant 1.000000e+00 : f32
    %67 = vector.broadcast %cst_18 : f32 to vector<8x128xf32>
    %68 = arith.addf %67, %66 : vector<8x128xf32>
    %69 = arith.divf %67, %68 : vector<8x128xf32>
    %70 = arith.select %41, %64, %69 : vector<8x128xi1>, vector<8x128xf32>
    %71 = vector.extract_strided_slice %70 {offsets = [0, 0], sizes = [8, 32], strides = [1, 1]} : vector<8x128xf32> to vector<8x32xf32>
    %72 = vector.extract_strided_slice %70 {offsets = [0, 32], sizes = [8, 32], strides = [1, 1]} : vector<8x128xf32> to vector<8x32xf32>
    %73 = vector.extract_strided_slice %70 {offsets = [0, 64], sizes = [8, 32], strides = [1, 1]} : vector<8x128xf32> to vector<8x32xf32>
    %74 = vector.extract_strided_slice %70 {offsets = [0, 96], sizes = [8, 32], strides = [1, 1]} : vector<8x128xf32> to vector<8x32xf32>
    %75 = arith.mulf %72, %42 : vector<8x32xf32>
    %76 = arith.mulf %71, %73 : vector<8x32xf32>
    %77 = arith.addf %75, %76 : vector<8x32xf32>
    %78 = math.tanh %77 : vector<8x32xf32>
    %79 = arith.mulf %74, %78 : vector<8x32xf32>
    %80 = vector.extract_strided_slice %33 {offsets = [8, 0], sizes = [8, 128], strides = [1, 1]} : vector<64x128xf32> to vector<8x128xf32>
    %81 = vector.extract_strided_slice %61 {offsets = [0, 0], sizes = [8, 128], strides = [1, 1]} : vector<8x256xf32> to vector<8x128xf32>
    %82 = arith.addf %80, %81 : vector<8x128xf32>
    %83 = math.tanh %82 : vector<8x128xf32>
    %84 = arith.negf %82 : vector<8x128xf32>
    %85 = math.exp %84 : vector<8x128xf32>
    %cst_19 = arith.constant 1.000000e+00 : f32
    %86 = vector.broadcast %cst_19 : f32 to vector<8x128xf32>
    %87 = arith.addf %86, %85 : vector<8x128xf32>
    %88 = arith.divf %86, %87 : vector<8x128xf32>
    %89 = arith.select %41, %83, %88 : vector<8x128xi1>, vector<8x128xf32>
    %90 = vector.extract_strided_slice %89 {offsets = [0, 0], sizes = [8, 32], strides = [1, 1]} : vector<8x128xf32> to vector<8x32xf32>
    %91 = vector.extract_strided_slice %89 {offsets = [0, 32], sizes = [8, 32], strides = [1, 1]} : vector<8x128xf32> to vector<8x32xf32>
    %92 = vector.extract_strided_slice %89 {offsets = [0, 64], sizes = [8, 32], strides = [1, 1]} : vector<8x128xf32> to vector<8x32xf32>
    %93 = vector.extract_strided_slice %89 {offsets = [0, 96], sizes = [8, 32], strides = [1, 1]} : vector<8x128xf32> to vector<8x32xf32>
    %94 = arith.mulf %91, %57 : vector<8x32xf32>
    %95 = arith.mulf %90, %92 : vector<8x32xf32>
    %96 = arith.addf %94, %95 : vector<8x32xf32>
    %97 = math.tanh %96 : vector<8x32xf32>
    %98 = arith.mulf %93, %97 : vector<8x32xf32>
    %99 = tpu.concatenate %98, %79 in 1 : vector<8x32xf32>, vector<8x32xf32> -> vector<8x64xf32>
    %cst_20 = arith.constant dense<0.000000e+00> : vector<8x256xf32>
    %100 = tpu.matmul %99, %6, %cst_20 {dimension_numbers = #tpu.dot_dimension_numbers<[1], [0], [0], [1], [0, 0, 1, 1], [], []>} : vector<8x64xf32>, vector<64x256xf32>, vector<8x256xf32> -> vector<8x256xf32>
    %101 = vector.extract_strided_slice %100 {offsets = [0, 128], sizes = [8, 128], strides = [1, 1]} : vector<8x256xf32> to vector<8x128xf32>
    %102 = arith.addf %101, %35 : vector<8x128xf32>
    %103 = math.tanh %102 : vector<8x128xf32>
    %104 = arith.negf %102 : vector<8x128xf32>
    %105 = math.exp %104 : vector<8x128xf32>
    %cst_21 = arith.constant 1.000000e+00 : f32
    %106 = vector.broadcast %cst_21 : f32 to vector<8x128xf32>
    %107 = arith.addf %106, %105 : vector<8x128xf32>
    %108 = arith.divf %106, %107 : vector<8x128xf32>
    %109 = arith.select %41, %103, %108 : vector<8x128xi1>, vector<8x128xf32>
    %110 = vector.extract_strided_slice %109 {offsets = [0, 0], sizes = [8, 32], strides = [1, 1]} : vector<8x128xf32> to vector<8x32xf32>
    %111 = vector.extract_strided_slice %109 {offsets = [0, 32], sizes = [8, 32], strides = [1, 1]} : vector<8x128xf32> to vector<8x32xf32>
    %112 = vector.extract_strided_slice %109 {offsets = [0, 64], sizes = [8, 32], strides = [1, 1]} : vector<8x128xf32> to vector<8x32xf32>
    %113 = vector.extract_strided_slice %109 {offsets = [0, 96], sizes = [8, 32], strides = [1, 1]} : vector<8x128xf32> to vector<8x32xf32>
    %114 = arith.mulf %111, %77 : vector<8x32xf32>
    %115 = arith.mulf %110, %112 : vector<8x32xf32>
    %116 = arith.addf %114, %115 : vector<8x32xf32>
    %117 = math.tanh %116 : vector<8x32xf32>
    %118 = arith.mulf %113, %117 : vector<8x32xf32>
    %119 = vector.extract_strided_slice %33 {offsets = [16, 0], sizes = [8, 128], strides = [1, 1]} : vector<64x128xf32> to vector<8x128xf32>
    %120 = vector.extract_strided_slice %100 {offsets = [0, 0], sizes = [8, 128], strides = [1, 1]} : vector<8x256xf32> to vector<8x128xf32>
    %121 = arith.addf %119, %120 : vector<8x128xf32>
    %122 = math.tanh %121 : vector<8x128xf32>
    %123 = arith.negf %121 : vector<8x128xf32>
    %124 = math.exp %123 : vector<8x128xf32>
    %cst_22 = arith.constant 1.000000e+00 : f32
    %125 = vector.broadcast %cst_22 : f32 to vector<8x128xf32>
    %126 = arith.addf %125, %124 : vector<8x128xf32>
    %127 = arith.divf %125, %126 : vector<8x128xf32>
    %128 = arith.select %41, %122, %127 : vector<8x128xi1>, vector<8x128xf32>
    %129 = vector.extract_strided_slice %128 {offsets = [0, 0], sizes = [8, 32], strides = [1, 1]} : vector<8x128xf32> to vector<8x32xf32>
    %130 = vector.extract_strided_slice %128 {offsets = [0, 32], sizes = [8, 32], strides = [1, 1]} : vector<8x128xf32> to vector<8x32xf32>
    %131 = vector.extract_strided_slice %128 {offsets = [0, 64], sizes = [8, 32], strides = [1, 1]} : vector<8x128xf32> to vector<8x32xf32>
    %132 = vector.extract_strided_slice %128 {offsets = [0, 96], sizes = [8, 32], strides = [1, 1]} : vector<8x128xf32> to vector<8x32xf32>
    %133 = arith.mulf %130, %96 : vector<8x32xf32>
    %134 = arith.mulf %129, %131 : vector<8x32xf32>
    %135 = arith.addf %133, %134 : vector<8x32xf32>
    %136 = math.tanh %135 : vector<8x32xf32>
    %137 = arith.mulf %132, %136 : vector<8x32xf32>
    %138 = tpu.concatenate %137, %118 in 1 : vector<8x32xf32>, vector<8x32xf32> -> vector<8x64xf32>
    %cst_23 = arith.constant dense<0.000000e+00> : vector<8x256xf32>
    %139 = tpu.matmul %138, %6, %cst_23 {dimension_numbers = #tpu.dot_dimension_numbers<[1], [0], [0], [1], [0, 0, 1, 1], [], []>} : vector<8x64xf32>, vector<64x256xf32>, vector<8x256xf32> -> vector<8x256xf32>
    %140 = vector.extract_strided_slice %139 {offsets = [0, 128], sizes = [8, 128], strides = [1, 1]} : vector<8x256xf32> to vector<8x128xf32>
    %141 = arith.addf %140, %35 : vector<8x128xf32>
    %142 = math.tanh %141 : vector<8x128xf32>
    %143 = arith.negf %141 : vector<8x128xf32>
    %144 = math.exp %143 : vector<8x128xf32>
    %cst_24 = arith.constant 1.000000e+00 : f32
    %145 = vector.broadcast %cst_24 : f32 to vector<8x128xf32>
    %146 = arith.addf %145, %144 : vector<8x128xf32>
    %147 = arith.divf %145, %146 : vector<8x128xf32>
    %148 = arith.select %41, %142, %147 : vector<8x128xi1>, vector<8x128xf32>
    %149 = vector.extract_strided_slice %148 {offsets = [0, 0], sizes = [8, 32], strides = [1, 1]} : vector<8x128xf32> to vector<8x32xf32>
    %150 = vector.extract_strided_slice %148 {offsets = [0, 32], sizes = [8, 32], strides = [1, 1]} : vector<8x128xf32> to vector<8x32xf32>
    %151 = vector.extract_strided_slice %148 {offsets = [0, 64], sizes = [8, 32], strides = [1, 1]} : vector<8x128xf32> to vector<8x32xf32>
    %152 = vector.extract_strided_slice %148 {offsets = [0, 96], sizes = [8, 32], strides = [1, 1]} : vector<8x128xf32> to vector<8x32xf32>
    %153 = arith.mulf %150, %116 : vector<8x32xf32>
    %154 = arith.mulf %149, %151 : vector<8x32xf32>
    %155 = arith.addf %153, %154 : vector<8x32xf32>
    %156 = math.tanh %155 : vector<8x32xf32>
    %157 = arith.mulf %152, %156 : vector<8x32xf32>
    %158 = vector.extract_strided_slice %33 {offsets = [24, 0], sizes = [8, 128], strides = [1, 1]} : vector<64x128xf32> to vector<8x128xf32>
    %159 = vector.extract_strided_slice %139 {offsets = [0, 0], sizes = [8, 128], strides = [1, 1]} : vector<8x256xf32> to vector<8x128xf32>
    %160 = arith.addf %158, %159 : vector<8x128xf32>
    %161 = math.tanh %160 : vector<8x128xf32>
    %162 = arith.negf %160 : vector<8x128xf32>
    %163 = math.exp %162 : vector<8x128xf32>
    %cst_25 = arith.constant 1.000000e+00 : f32
    %164 = vector.broadcast %cst_25 : f32 to vector<8x128xf32>
    %165 = arith.addf %164, %163 : vector<8x128xf32>
    %166 = arith.divf %164, %165 : vector<8x128xf32>
    %167 = arith.select %41, %161, %166 : vector<8x128xi1>, vector<8x128xf32>
    %168 = vector.extract_strided_slice %167 {offsets = [0, 0], sizes = [8, 32], strides = [1, 1]} : vector<8x128xf32> to vector<8x32xf32>
    %169 = vector.extract_strided_slice %167 {offsets = [0, 32], sizes = [8, 32], strides = [1, 1]} : vector<8x128xf32> to vector<8x32xf32>
    %170 = vector.extract_strided_slice %167 {offsets = [0, 64], sizes = [8, 32], strides = [1, 1]} : vector<8x128xf32> to vector<8x32xf32>
    %171 = vector.extract_strided_slice %167 {offsets = [0, 96], sizes = [8, 32], strides = [1, 1]} : vector<8x128xf32> to vector<8x32xf32>
    %172 = arith.mulf %169, %135 : vector<8x32xf32>
    %173 = arith.mulf %168, %170 : vector<8x32xf32>
    %174 = arith.addf %172, %173 : vector<8x32xf32>
    %175 = math.tanh %174 : vector<8x32xf32>
    %176 = arith.mulf %171, %175 : vector<8x32xf32>
    %177 = tpu.concatenate %176, %157 in 1 : vector<8x32xf32>, vector<8x32xf32> -> vector<8x64xf32>
    %cst_26 = arith.constant dense<0.000000e+00> : vector<8x256xf32>
    %178 = tpu.matmul %177, %6, %cst_26 {dimension_numbers = #tpu.dot_dimension_numbers<[1], [0], [0], [1], [0, 0, 1, 1], [], []>} : vector<8x64xf32>, vector<64x256xf32>, vector<8x256xf32> -> vector<8x256xf32>
    %179 = vector.extract_strided_slice %178 {offsets = [0, 128], sizes = [8, 128], strides = [1, 1]} : vector<8x256xf32> to vector<8x128xf32>
    %180 = arith.addf %179, %35 : vector<8x128xf32>
    %181 = math.tanh %180 : vector<8x128xf32>
    %182 = arith.negf %180 : vector<8x128xf32>
    %183 = math.exp %182 : vector<8x128xf32>
    %cst_27 = arith.constant 1.000000e+00 : f32
    %184 = vector.broadcast %cst_27 : f32 to vector<8x128xf32>
    %185 = arith.addf %184, %183 : vector<8x128xf32>
    %186 = arith.divf %184, %185 : vector<8x128xf32>
    %187 = arith.select %41, %181, %186 : vector<8x128xi1>, vector<8x128xf32>
    %188 = vector.extract_strided_slice %187 {offsets = [0, 0], sizes = [8, 32], strides = [1, 1]} : vector<8x128xf32> to vector<8x32xf32>
    %189 = vector.extract_strided_slice %187 {offsets = [0, 32], sizes = [8, 32], strides = [1, 1]} : vector<8x128xf32> to vector<8x32xf32>
    %190 = vector.extract_strided_slice %187 {offsets = [0, 64], sizes = [8, 32], strides = [1, 1]} : vector<8x128xf32> to vector<8x32xf32>
    %191 = vector.extract_strided_slice %187 {offsets = [0, 96], sizes = [8, 32], strides = [1, 1]} : vector<8x128xf32> to vector<8x32xf32>
    %192 = arith.mulf %189, %155 : vector<8x32xf32>
    %193 = arith.mulf %188, %190 : vector<8x32xf32>
    %194 = arith.addf %192, %193 : vector<8x32xf32>
    %195 = math.tanh %194 : vector<8x32xf32>
    %196 = arith.mulf %191, %195 : vector<8x32xf32>
    %197 = vector.extract_strided_slice %33 {offsets = [32, 0], sizes = [8, 128], strides = [1, 1]} : vector<64x128xf32> to vector<8x128xf32>
    %198 = vector.extract_strided_slice %178 {offsets = [0, 0], sizes = [8, 128], strides = [1, 1]} : vector<8x256xf32> to vector<8x128xf32>
    %199 = arith.addf %197, %198 : vector<8x128xf32>
    %200 = math.tanh %199 : vector<8x128xf32>
    %201 = arith.negf %199 : vector<8x128xf32>
    %202 = math.exp %201 : vector<8x128xf32>
    %cst_28 = arith.constant 1.000000e+00 : f32
    %203 = vector.broadcast %cst_28 : f32 to vector<8x128xf32>
    %204 = arith.addf %203, %202 : vector<8x128xf32>
    %205 = arith.divf %203, %204 : vector<8x128xf32>
    %206 = arith.select %41, %200, %205 : vector<8x128xi1>, vector<8x128xf32>
    %207 = vector.extract_strided_slice %206 {offsets = [0, 0], sizes = [8, 32], strides = [1, 1]} : vector<8x128xf32> to vector<8x32xf32>
    %208 = vector.extract_strided_slice %206 {offsets = [0, 32], sizes = [8, 32], strides = [1, 1]} : vector<8x128xf32> to vector<8x32xf32>
    %209 = vector.extract_strided_slice %206 {offsets = [0, 64], sizes = [8, 32], strides = [1, 1]} : vector<8x128xf32> to vector<8x32xf32>
    %210 = vector.extract_strided_slice %206 {offsets = [0, 96], sizes = [8, 32], strides = [1, 1]} : vector<8x128xf32> to vector<8x32xf32>
    %211 = arith.mulf %208, %174 : vector<8x32xf32>
    %212 = arith.mulf %207, %209 : vector<8x32xf32>
    %213 = arith.addf %211, %212 : vector<8x32xf32>
    %214 = math.tanh %213 : vector<8x32xf32>
    %215 = arith.mulf %210, %214 : vector<8x32xf32>
    %216 = tpu.concatenate %215, %196 in 1 : vector<8x32xf32>, vector<8x32xf32> -> vector<8x64xf32>
    %cst_29 = arith.constant dense<0.000000e+00> : vector<8x256xf32>
    %217 = tpu.matmul %216, %6, %cst_29 {dimension_numbers = #tpu.dot_dimension_numbers<[1], [0], [0], [1], [0, 0, 1, 1], [], []>} : vector<8x64xf32>, vector<64x256xf32>, vector<8x256xf32> -> vector<8x256xf32>
    %218 = vector.extract_strided_slice %217 {offsets = [0, 128], sizes = [8, 128], strides = [1, 1]} : vector<8x256xf32> to vector<8x128xf32>
    %219 = arith.addf %218, %35 : vector<8x128xf32>
    %220 = math.tanh %219 : vector<8x128xf32>
    %221 = arith.negf %219 : vector<8x128xf32>
    %222 = math.exp %221 : vector<8x128xf32>
    %cst_30 = arith.constant 1.000000e+00 : f32
    %223 = vector.broadcast %cst_30 : f32 to vector<8x128xf32>
    %224 = arith.addf %223, %222 : vector<8x128xf32>
    %225 = arith.divf %223, %224 : vector<8x128xf32>
    %226 = arith.select %41, %220, %225 : vector<8x128xi1>, vector<8x128xf32>
    %227 = vector.extract_strided_slice %226 {offsets = [0, 0], sizes = [8, 32], strides = [1, 1]} : vector<8x128xf32> to vector<8x32xf32>
    %228 = vector.extract_strided_slice %226 {offsets = [0, 32], sizes = [8, 32], strides = [1, 1]} : vector<8x128xf32> to vector<8x32xf32>
    %229 = vector.extract_strided_slice %226 {offsets = [0, 64], sizes = [8, 32], strides = [1, 1]} : vector<8x128xf32> to vector<8x32xf32>
    %230 = vector.extract_strided_slice %226 {offsets = [0, 96], sizes = [8, 32], strides = [1, 1]} : vector<8x128xf32> to vector<8x32xf32>
    %231 = arith.mulf %228, %194 : vector<8x32xf32>
    %232 = arith.mulf %227, %229 : vector<8x32xf32>
    %233 = arith.addf %231, %232 : vector<8x32xf32>
    %234 = math.tanh %233 : vector<8x32xf32>
    %235 = arith.mulf %230, %234 : vector<8x32xf32>
    %236 = vector.extract_strided_slice %33 {offsets = [40, 0], sizes = [8, 128], strides = [1, 1]} : vector<64x128xf32> to vector<8x128xf32>
    %237 = vector.extract_strided_slice %217 {offsets = [0, 0], sizes = [8, 128], strides = [1, 1]} : vector<8x256xf32> to vector<8x128xf32>
    %238 = arith.addf %236, %237 : vector<8x128xf32>
    %239 = math.tanh %238 : vector<8x128xf32>
    %240 = arith.negf %238 : vector<8x128xf32>
    %241 = math.exp %240 : vector<8x128xf32>
    %cst_31 = arith.constant 1.000000e+00 : f32
    %242 = vector.broadcast %cst_31 : f32 to vector<8x128xf32>
    %243 = arith.addf %242, %241 : vector<8x128xf32>
    %244 = arith.divf %242, %243 : vector<8x128xf32>
    %245 = arith.select %41, %239, %244 : vector<8x128xi1>, vector<8x128xf32>
    %246 = vector.extract_strided_slice %245 {offsets = [0, 0], sizes = [8, 32], strides = [1, 1]} : vector<8x128xf32> to vector<8x32xf32>
    %247 = vector.extract_strided_slice %245 {offsets = [0, 32], sizes = [8, 32], strides = [1, 1]} : vector<8x128xf32> to vector<8x32xf32>
    %248 = vector.extract_strided_slice %245 {offsets = [0, 64], sizes = [8, 32], strides = [1, 1]} : vector<8x128xf32> to vector<8x32xf32>
    %249 = vector.extract_strided_slice %245 {offsets = [0, 96], sizes = [8, 32], strides = [1, 1]} : vector<8x128xf32> to vector<8x32xf32>
    %250 = arith.mulf %247, %213 : vector<8x32xf32>
    %251 = arith.mulf %246, %248 : vector<8x32xf32>
    %252 = arith.addf %250, %251 : vector<8x32xf32>
    %253 = math.tanh %252 : vector<8x32xf32>
    %254 = arith.mulf %249, %253 : vector<8x32xf32>
    %255 = tpu.concatenate %254, %235 in 1 : vector<8x32xf32>, vector<8x32xf32> -> vector<8x64xf32>
    %cst_32 = arith.constant dense<0.000000e+00> : vector<8x256xf32>
    %256 = tpu.matmul %255, %6, %cst_32 {dimension_numbers = #tpu.dot_dimension_numbers<[1], [0], [0], [1], [0, 0, 1, 1], [], []>} : vector<8x64xf32>, vector<64x256xf32>, vector<8x256xf32> -> vector<8x256xf32>
    %257 = vector.extract_strided_slice %256 {offsets = [0, 128], sizes = [8, 128], strides = [1, 1]} : vector<8x256xf32> to vector<8x128xf32>
    %258 = arith.addf %257, %35 : vector<8x128xf32>
    %259 = math.tanh %258 : vector<8x128xf32>
    %260 = arith.negf %258 : vector<8x128xf32>
    %261 = math.exp %260 : vector<8x128xf32>
    %cst_33 = arith.constant 1.000000e+00 : f32
    %262 = vector.broadcast %cst_33 : f32 to vector<8x128xf32>
    %263 = arith.addf %262, %261 : vector<8x128xf32>
    %264 = arith.divf %262, %263 : vector<8x128xf32>
    %265 = arith.select %41, %259, %264 : vector<8x128xi1>, vector<8x128xf32>
    %266 = vector.extract_strided_slice %265 {offsets = [0, 0], sizes = [8, 32], strides = [1, 1]} : vector<8x128xf32> to vector<8x32xf32>
    %267 = vector.extract_strided_slice %265 {offsets = [0, 32], sizes = [8, 32], strides = [1, 1]} : vector<8x128xf32> to vector<8x32xf32>
    %268 = vector.extract_strided_slice %265 {offsets = [0, 64], sizes = [8, 32], strides = [1, 1]} : vector<8x128xf32> to vector<8x32xf32>
    %269 = vector.extract_strided_slice %265 {offsets = [0, 96], sizes = [8, 32], strides = [1, 1]} : vector<8x128xf32> to vector<8x32xf32>
    %270 = arith.mulf %267, %233 : vector<8x32xf32>
    %271 = arith.mulf %266, %268 : vector<8x32xf32>
    %272 = arith.addf %270, %271 : vector<8x32xf32>
    %273 = math.tanh %272 : vector<8x32xf32>
    %274 = arith.mulf %269, %273 : vector<8x32xf32>
    %275 = vector.extract_strided_slice %33 {offsets = [48, 0], sizes = [8, 128], strides = [1, 1]} : vector<64x128xf32> to vector<8x128xf32>
    %276 = vector.extract_strided_slice %256 {offsets = [0, 0], sizes = [8, 128], strides = [1, 1]} : vector<8x256xf32> to vector<8x128xf32>
    %277 = arith.addf %275, %276 : vector<8x128xf32>
    %278 = math.tanh %277 : vector<8x128xf32>
    %279 = arith.negf %277 : vector<8x128xf32>
    %280 = math.exp %279 : vector<8x128xf32>
    %cst_34 = arith.constant 1.000000e+00 : f32
    %281 = vector.broadcast %cst_34 : f32 to vector<8x128xf32>
    %282 = arith.addf %281, %280 : vector<8x128xf32>
    %283 = arith.divf %281, %282 : vector<8x128xf32>
    %284 = arith.select %41, %278, %283 : vector<8x128xi1>, vector<8x128xf32>
    %285 = vector.extract_strided_slice %284 {offsets = [0, 0], sizes = [8, 32], strides = [1, 1]} : vector<8x128xf32> to vector<8x32xf32>
    %286 = vector.extract_strided_slice %284 {offsets = [0, 32], sizes = [8, 32], strides = [1, 1]} : vector<8x128xf32> to vector<8x32xf32>
    %287 = vector.extract_strided_slice %284 {offsets = [0, 64], sizes = [8, 32], strides = [1, 1]} : vector<8x128xf32> to vector<8x32xf32>
    %288 = vector.extract_strided_slice %284 {offsets = [0, 96], sizes = [8, 32], strides = [1, 1]} : vector<8x128xf32> to vector<8x32xf32>
    %289 = arith.mulf %286, %252 : vector<8x32xf32>
    %290 = arith.mulf %285, %287 : vector<8x32xf32>
    %291 = arith.addf %289, %290 : vector<8x32xf32>
    %292 = math.tanh %291 : vector<8x32xf32>
    %293 = arith.mulf %288, %292 : vector<8x32xf32>
    %294 = tpu.concatenate %293, %274 in 1 : vector<8x32xf32>, vector<8x32xf32> -> vector<8x64xf32>
    %cst_35 = arith.constant dense<0.000000e+00> : vector<8x256xf32>
    %295 = tpu.matmul %294, %6, %cst_35 {dimension_numbers = #tpu.dot_dimension_numbers<[1], [0], [0], [1], [0, 0, 1, 1], [], []>} : vector<8x64xf32>, vector<64x256xf32>, vector<8x256xf32> -> vector<8x256xf32>
    %296 = vector.extract_strided_slice %295 {offsets = [0, 128], sizes = [8, 128], strides = [1, 1]} : vector<8x256xf32> to vector<8x128xf32>
    %297 = arith.addf %296, %35 : vector<8x128xf32>
    %298 = math.tanh %297 : vector<8x128xf32>
    %299 = arith.negf %297 : vector<8x128xf32>
    %300 = math.exp %299 : vector<8x128xf32>
    %cst_36 = arith.constant 1.000000e+00 : f32
    %301 = vector.broadcast %cst_36 : f32 to vector<8x128xf32>
    %302 = arith.addf %301, %300 : vector<8x128xf32>
    %303 = arith.divf %301, %302 : vector<8x128xf32>
    %304 = arith.select %41, %298, %303 : vector<8x128xi1>, vector<8x128xf32>
    %305 = vector.extract_strided_slice %304 {offsets = [0, 0], sizes = [8, 32], strides = [1, 1]} : vector<8x128xf32> to vector<8x32xf32>
    %306 = vector.extract_strided_slice %304 {offsets = [0, 32], sizes = [8, 32], strides = [1, 1]} : vector<8x128xf32> to vector<8x32xf32>
    %307 = vector.extract_strided_slice %304 {offsets = [0, 64], sizes = [8, 32], strides = [1, 1]} : vector<8x128xf32> to vector<8x32xf32>
    %308 = vector.extract_strided_slice %304 {offsets = [0, 96], sizes = [8, 32], strides = [1, 1]} : vector<8x128xf32> to vector<8x32xf32>
    %309 = arith.mulf %306, %272 : vector<8x32xf32>
    %310 = arith.mulf %305, %307 : vector<8x32xf32>
    %311 = arith.addf %309, %310 : vector<8x32xf32>
    %312 = math.tanh %311 : vector<8x32xf32>
    %313 = arith.mulf %308, %312 : vector<8x32xf32>
    %314 = vector.extract_strided_slice %33 {offsets = [56, 0], sizes = [8, 128], strides = [1, 1]} : vector<64x128xf32> to vector<8x128xf32>
    %315 = vector.extract_strided_slice %295 {offsets = [0, 0], sizes = [8, 128], strides = [1, 1]} : vector<8x256xf32> to vector<8x128xf32>
    %316 = arith.addf %314, %315 : vector<8x128xf32>
    %317 = math.tanh %316 : vector<8x128xf32>
    %318 = arith.negf %316 : vector<8x128xf32>
    %319 = math.exp %318 : vector<8x128xf32>
    %cst_37 = arith.constant 1.000000e+00 : f32
    %320 = vector.broadcast %cst_37 : f32 to vector<8x128xf32>
    %321 = arith.addf %320, %319 : vector<8x128xf32>
    %322 = arith.divf %320, %321 : vector<8x128xf32>
    %323 = arith.select %41, %317, %322 : vector<8x128xi1>, vector<8x128xf32>
    %324 = vector.extract_strided_slice %323 {offsets = [0, 0], sizes = [8, 32], strides = [1, 1]} : vector<8x128xf32> to vector<8x32xf32>
    %325 = vector.extract_strided_slice %323 {offsets = [0, 32], sizes = [8, 32], strides = [1, 1]} : vector<8x128xf32> to vector<8x32xf32>
    %326 = vector.extract_strided_slice %323 {offsets = [0, 64], sizes = [8, 32], strides = [1, 1]} : vector<8x128xf32> to vector<8x32xf32>
    %327 = vector.extract_strided_slice %323 {offsets = [0, 96], sizes = [8, 32], strides = [1, 1]} : vector<8x128xf32> to vector<8x32xf32>
    %328 = arith.mulf %325, %291 : vector<8x32xf32>
    %329 = arith.mulf %324, %326 : vector<8x32xf32>
    %330 = arith.addf %328, %329 : vector<8x32xf32>
    %331 = math.tanh %330 : vector<8x32xf32>
    %332 = arith.mulf %327, %331 : vector<8x32xf32>
    %333 = tpu.concatenate %332, %313 in 1 : vector<8x32xf32>, vector<8x32xf32> -> vector<8x64xf32>
    %cst_38 = arith.constant dense<0.000000e+00> : vector<8x256xf32>
    %334 = tpu.matmul %333, %6, %cst_38 {dimension_numbers = #tpu.dot_dimension_numbers<[1], [0], [0], [1], [0, 0, 1, 1], [], []>} : vector<8x64xf32>, vector<64x256xf32>, vector<8x256xf32> -> vector<8x256xf32>
    %335 = vector.extract_strided_slice %334 {offsets = [0, 128], sizes = [8, 128], strides = [1, 1]} : vector<8x256xf32> to vector<8x128xf32>
    %336 = arith.addf %335, %35 : vector<8x128xf32>
    %337 = math.tanh %336 : vector<8x128xf32>
    %338 = arith.negf %336 : vector<8x128xf32>
    %339 = math.exp %338 : vector<8x128xf32>
    %cst_39 = arith.constant 1.000000e+00 : f32
    %340 = vector.broadcast %cst_39 : f32 to vector<8x128xf32>
    %341 = arith.addf %340, %339 : vector<8x128xf32>
    %342 = arith.divf %340, %341 : vector<8x128xf32>
    %343 = arith.select %41, %337, %342 : vector<8x128xi1>, vector<8x128xf32>
    %344 = vector.extract_strided_slice %343 {offsets = [0, 0], sizes = [8, 32], strides = [1, 1]} : vector<8x128xf32> to vector<8x32xf32>
    %345 = vector.extract_strided_slice %343 {offsets = [0, 32], sizes = [8, 32], strides = [1, 1]} : vector<8x128xf32> to vector<8x32xf32>
    %346 = vector.extract_strided_slice %343 {offsets = [0, 64], sizes = [8, 32], strides = [1, 1]} : vector<8x128xf32> to vector<8x32xf32>
    %347 = vector.extract_strided_slice %343 {offsets = [0, 96], sizes = [8, 32], strides = [1, 1]} : vector<8x128xf32> to vector<8x32xf32>
    %348 = arith.mulf %345, %311 : vector<8x32xf32>
    %349 = arith.mulf %344, %346 : vector<8x32xf32>
    %350 = arith.addf %348, %349 : vector<8x32xf32>
    %351 = math.tanh %350 : vector<8x32xf32>
    %352 = arith.mulf %347, %351 : vector<8x32xf32>
    %353 = tpu.concatenate %332, %352 in 0 : vector<8x32xf32>, vector<8x32xf32> -> vector<16x32xf32>
    %cst_40 = arith.constant dense<0.000000e+00> : vector<16x128xf32>
    %354 = tpu.matmul %353, %7, %cst_40 {dimension_numbers = #tpu.dot_dimension_numbers<[1], [0], [0], [1], [0, 0, 1, 1], [], []>} : vector<16x32xf32>, vector<32x128xf32>, vector<16x128xf32> -> vector<16x128xf32>
    %355 = vector.broadcast %4 : vector<1x128xf32> to vector<16x128xf32>
    %356 = arith.addf %354, %355 : vector<16x128xf32>
    %c0_41 = arith.constant 0 : index
    %c0_42 = arith.constant 0 : index
    %357 = vector.load %arg2[%c0_41, %c0_42] : memref<16x128xf32, #tpu.memory_space<vmem>>, vector<16x128xf32>
    tpu.vector_store %arg2[%c0_41, %c0_42], %356 {strides = array<i32>} : memref<16x128xf32, #tpu.memory_space<vmem>>, vector<16x128xf32>,
    return
  }
}

</mosaic_0001>

<bundles_post_ra>
// kernel: model_forward.1
= control target key start
LH: loop header
LB: loop body
LE: loop exit
PB: predicated region body
PF: predicated region fallthrough
CT: control target
= control target key end

     0   :  { %7 = vsyncpa [#allocation3], 0  ;;  %s1742_s9 = smov [#allocation2]   ;;  %s2222_s0 = inlined_call_operand.vmem [shape: f32[64,16], index: 0, kind: input, shape index: {}]   ;;  %s2223_s1 = inlined_call_operand.hbm [shape: f32[120,256], index: 1, kind: input, shape index: {}]   ;;  %s2224_s2 = inlined_call_operand.vmem [shape: f32[16,128], index: 2, kind: output, shape index: {}]  }
   0x1   :  { %s15_s10 = sshll.u32 %s1742_s9, 4  ;;  %s16_s10 = int_to_ptr.vmem [resolvable:$true] %s15_s10 }
   0x2   :  { %s1728_s11 = scalar_lea.vmem %s16_s10, 3840  ;;  %p1733_p1 = scmp.lt.s32.totalorder %s16_s10, %s16_s10 }
   0x3   :  { %p1729_p0 = scmp.ne.s32.totalorder %s16_s10, %s1728_s11  ;;  %p1734_p2 = scmp.lt.s32.totalorder %s1728_s11, %s1728_s11 }
   0x5   :  { %p1735_p3 = por %p1734_p2, %p1733_p1 }
   0x7   :  { %p1736_p4 = pnand %p1735_p3, %p1729_p0 }
   0x9   :  { %1739 = shalt.err (!%p1736_p4)
}
   0xa   :  { %s1743_s12 = smov 256   ;;  %s1744_s13 = smov 16  }
   0xb   :  { %21 = dma.hbm_to_vmem [thread:$0]  %s2223_s1, 3840, %s16_s10, [#allocation3], %s1743_s12, %s1743_s12, %s1744_s13  }
   0xc   :  { %1740 = dma.done.wait [#allocation3], 3840  }
   0xd   :  { %1741 = vsyncadd [#allocation3], 4294963456  ;;  %vm60_vm0 = vcmask 130048   ;;  %v52_v0 = vld [vmem:[%s2222_s0] sm:$0xff]  ;;  %v53_v1 = vld [vmem:[%s2222_s0 + $0x8] sm:$0xff]  ;;  %v311_v39 = vlaneseq  ;;  %s1745_s1 = smov 64  }
   0xe   :  { %v61_v2 = vsel %vm60_vm0, %v52_v0, 0.0  ;;  %v64_v3 = vsel %vm60_vm0, %v53_v1, 0.0  ;;  %v31_v14 = vld [vmem:[#allocation2 + $0x20] sm:$0xff]  ;;  %v30_v15 = vld [vmem:[#allocation2 + $0x10] sm:$0xff]  ;;  %s1746_s20 = smov 32   ;;  %v1807_v50 = vld [vmem:[#allocation2 + $0xa8] sm:$0xff] }
   0xf   :  { %62 = vadd.xlane.f32.xlu0 %v61_v2  ;;  %1531 = vmatprep.subr.mxu0 %v31_v14  ;;  %v1776_v23 = vld [vmem:[#allocation2] ss:$0 sm:$0xff]  ;;  %v1778_v25 = vld [vmem:[#allocation2 + $0x1] ss:$0 sm:$0xff]  ;;  %v1788_v33 = vld [vmem:[#allocation2 + $0x2] ss:$0 sm:$0xff] }
  0x10   :  { %1532 = vmatpush3.msra.mxu0 %v31_v14  ;;  %v312_v40 = vand.u32 127, %v311_v39  ;;  %v1809_v51 = vld [vmem:[#allocation2 + $0xa0] sm:$0xff]  ;;  %v1811_v52 = vld [vmem:[#allocation2 + $0x98] sm:$0xff]  ;;  %367 = vmatprep.subr.mxu1 %v1807_v50  ;;  %v1814_v53 = vld [vmem:[#allocation2 + $0x90] sm:$0xff]  ;;  %vm345_vm4 = vcmask 261120   ;;  %vm347_vm5 = vcmask 523264  }
  0x11   :  { %1533 = vmatprep.subr.mxu0 %v30_v15  ;;  %368 = vmatpush1.msra.mxu1 %v1809_v51  ;;  %v1818_v54 = vld [vmem:[#allocation2 + $0x88] sm:$0xff]  ;;  %v1822_v55 = vld [vmem:[#allocation2 + $0x80] sm:$0xff]  ;;  %v1826_v56 = vld [vmem:[#allocation2 + $0x78] sm:$0xff] }
  0x12   :  { %1534 = vmatpush3.msra.mxu0 %v30_v15  ;;  %vm313_vm1 = vcmp.ge.s32.totalorder %v312_v40, 64  ;;  %vm314_vm2 = vcmp.lt.s32.totalorder %v312_v40, 96  ;;  %369 = vmatprep.subr.mxu1 %v1811_v52  ;;  %v1830_v57 = vld [vmem:[#allocation2 + $0x70] sm:$0xff]  ;;  %v1834_v58 = vld [vmem:[#allocation2 + $0x68] sm:$0xff]  ;;  %v1838_v59 = vld [vmem:[#allocation2 + $0x60] sm:$0xff] }
  0x13   :  { %65 = vadd.xlane.f32.xlu0 %v64_v3  ;;  %vm1791_vm3 = vmand %vm313_vm1, %vm314_vm2  ;;  %502 = vmatprep.subr.mxu0 %v1807_v50  ;;  %v1842_v60 = vld [vmem:[#allocation2 + $0x58] sm:$0xff]  ;;  %v1846_v61 = vld [vmem:[#allocation2 + $0x50] sm:$0xff]  ;;  %v1747_v3 = vmov 0.0  }
  0x14   :  { %370 = vmatpush1.msra.mxu1 %v1814_v53  ;;  %v1850_v63 = vld [vmem:[#allocation2 + $0x48] sm:$0xff]  ;;  %v1868_v2 = vld [vmem:[#allocation2 + $0x30] sm:$0xff]  ;;  %415 = vmatprep.mubr.f32.mxu1 %v1747_v3 }
  0x15   :  { %371 = vmatprep.subr.mxu1 %v1818_v54  ;;  %v58_v40 = vld [vmem:[%s2222_s0 + $0x30] sm:$0xff] }
  0x16   :  { %372 = vmatpush1.msra.mxu1 %v1822_v55 }
  0x17   :  { %373 = vmatprep.subr.mxu1 %v1826_v56 }
  0x18   :  { %374 = vmatpush1.msra.mxu1 %v1830_v57 }
  0x19   :  { %375 = vmatprep.subr.mxu1 %v1834_v58 }
  0x1a   :  { %376 = vmatpush1.msra.mxu1 %v1838_v59 }
  0x1b   :  { %377 = vmatprep.subr.mxu1 %v1842_v60 }
  0x1c   :  { %378 = vmatpush1.msra.mxu1 %v1846_v61 }
  0x1d   :  { %379 = vmatprep.subr.mxu1 %v1850_v63 }
  0x98   :  { %v63_v4 = vpop.xlane.xlu0 %62 }
  0x99   :  { %v86_v5 = vmul.f32 0.0625, %v63_v4 }
  0x9b   :  { %v94_v6 = vsub.f32 %v52_v0, %v86_v5  ;;  %v1855_v0 = vld [vmem:[#allocation2 + $0x40] sm:$0xff] }
  0x9c   :  { %v66_v7 = vpop.xlane.xlu0 %65  ;;  %380 = vmatpush1.msra.mxu1 %v1855_v0 }
  0x9d   :  { %v87_v8 = vmul.f32 0.0625, %v66_v7  ;;  %v102_v9 = vmul.f32 %v94_v6, %v94_v6 }
  0x9f   :  { %v95_v10 = vsub.f32 %v53_v1, %v87_v8  ;;  %v110_v11 = vsel %vm60_vm0, %v102_v9, 0.0  ;;  %v1858_v1 = vld [vmem:[#allocation2 + $0x38] sm:$0xff]  ;;  %v54_v8 = vld [vmem:[%s2222_s0 + $0x10] sm:$0xff] }
  0xa0   :  { %111 = vadd.xlane.f32.xlu1 %v110_v11  ;;  %381 = vmatprep.subr.mxu1 %v1858_v1  ;;  %v67_v9 = vsel %vm60_vm0, %v54_v8, 0.0 }
  0xa1   :  { %v103_v12 = vmul.f32 %v95_v10, %v95_v10  ;;  %382 = vmatpush1.msra.mxu1 %v1868_v2 }
  0xa2   :  { %637 = vmatprep.subr.mxu1 %v1807_v50 }
  0xa3   :  { %v113_v13 = vsel %vm60_vm0, %v103_v12, 0.0  ;;  %v1902_v12 = vld [vmem:[#allocation2 + $0xa] ss:$0 sm:$0xff] }
  0xa4   :  { %114 = vadd.xlane.f32.xlu1 %v113_v13 }
 0x129   :  { %v112_v16 = vpop.xlane.xlu1 %111 }
 0x12a   :  { %v134_v17 = vmul.f32 0.0625, %v112_v16 }
 0x12c   :  { %v142_v18 = vadd.f32 1e-05, %v134_v17 }
 0x12d   :  { %v115_v19 = vpop.xlane.xlu1 %114 }
 0x12e   :  { %1564 = vrsqrt.f32 %v142_v18  ;;  %v135_v20 = vmul.f32 0.0625, %v115_v19 }
 0x130   :  { %v143_v21 = vadd.f32 1e-05, %v135_v20 }
 0x132   :  { %1566 = vrsqrt.f32 %v143_v21 }
 0x13b   :  { %v1565_v22 = vpop.eup %1564 }
 0x13c   :  { %v158_v24 = vmul.f32 %v1565_v22, %v94_v6 }
 0x13e   :  { %v166_v26 = vmul.f32 %v158_v24, %v1776_v23 }
 0x13f   :  { %v1567_v27 = vpop.eup %1566 }
 0x140   :  { %v174_v28 = vadd.f32 %v166_v26, %v1778_v25  ;;  %v159_v29 = vmul.f32 %v1567_v27, %v95_v10 }
 0x142   :  { %1535 = vmatprep.mubr.msk.f32.mxu0 %vm60_vm0, %v174_v28  ;;  %v167_v30 = vmul.f32 %v159_v29, %v1776_v23 }
 0x144   :  { %v175_v31 = vadd.f32 %v167_v30, %v1778_v25  ;;  %v56_v30 = vld [vmem:[%s2222_s0 + $0x20] sm:$0xff] }
 0x146   :  { %1536 = vmatmul.mubr.msk.f32.vlgmr.msra.gmra.mxu0 %vm60_vm0, %v175_v31  ;;  %v73_v31 = vsel %vm60_vm0, %v56_v30, 0.0 }
 0x147   :  { %503 = vmatpush1.msra.mxu0 %v1809_v51 }
 0x148   :  { %504 = vmatprep.subr.mxu0 %v1811_v52 }
 0x149   :  { %505 = vmatpush1.msra.mxu0 %v1814_v53 }
 0x14a   :  { %506 = vmatprep.subr.mxu0 %v1818_v54 }
 0x14b   :  { %507 = vmatpush1.msra.mxu0 %v1822_v55 }
 0x14c   :  { %508 = vmatprep.subr.mxu0 %v1826_v56 }
 0x14d   :  { %509 = vmatpush1.msra.mxu0 %v1830_v57 }
 0x14e   :  { %510 = vmatprep.subr.mxu0 %v1834_v58 }
 0x14f   :  { %511 = vmatpush1.msra.mxu0 %v1838_v59 }
 0x150   :  { %512 = vmatprep.subr.mxu0 %v1842_v60 }
 0x151   :  { %513 = vmatpush1.msra.mxu0 %v1846_v61 }
 0x152   :  { %514 = vmatprep.subr.mxu0 %v1850_v63 }
 0x153   :  { %515 = vmatpush1.msra.mxu0 %v1855_v0 }
 0x154   :  { %516 = vmatprep.subr.mxu0 %v1858_v1 }
 0x155   :  { %517 = vmatpush1.msra.mxu0 %v1868_v2 }
 0x156   :  { %772 = vmatprep.subr.mxu0 %v1807_v50 }
 0x206   :  { %v1786_v32 = vpop.f32.mrf.mxu0 }
 0x207   :  { %v278_v10 = vadd.f32 %v1786_v32, %v1788_v33  ;;  %v57_v32 = vld [vmem:[%s2222_s0 + $0x28] sm:$0xff] }
 0x208   :  { %v272_v34 = vpop.f32.mrf.mxu0 }
 0x209   :  { %v273_v35 = vadd.f32 %v272_v34, %v1788_v33  ;;  %v76_v34 = vsel %vm60_vm0, %v57_v32, 0.0 }
 0x20b   :  { %v1489_v36 = vmul.f32 -1.442695, %v273_v35 }
 0x20d   :  { %1568 = vpow2.f32 %v1489_v36 }
 0x20e   :  { %1570 = vtanh.f32 %v273_v35 }
 0x21a   :  { %v1569_v37 = vpop.eup %1568 }
 0x21b   :  { %v320_v38 = vadd.f32 1.0, %v1569_v37  ;;  %v1571_v42 = vpop.eup %1570 }
 0x21d   :  { %1572 = vrcp.f32 %v320_v38 }
 0x22a   :  { %v1573_v43 = vpop.eup %1572 }
 0x22b   :  { %v1797_v44 = vsel %vm1791_vm3, %v1571_v42, %v1573_v43  ;;  %v55_v43 = vld [vmem:[%s2222_s0 + $0x18] sm:$0xff] }
 0x22c   :  { %326 = vrot.lane.b32.xlu0 %v1797_v44, %s1745_s1  ;;  %v324_v47 = vmul.f32 0.0, %v1797_v44 }
 0x24b   :  { %68 = vadd.xlane.f32.xlu0 %v67_v9 }
 0x29e   :  { %v327_v45 = vpop.permute.xlu0 %326 }
 0x29f   :  { %v329_v46 = vmul.f32 %v327_v45, %v1797_v44 }
 0x2a1   :  { %331 = vrot.lane.b32.xlu1 %v329_v46, %s1746_s20  ;;  %v70_v46 = vsel %vm60_vm0, %v55_v43, 0.0 }
 0x2d4   :  { %v69_v35 = vpop.xlane.xlu0 %68 }
 0x2d5   :  { %v88_v42 = vmul.f32 0.0625, %v69_v35 }
 0x2d7   :  { %v96_v45 = vsub.f32 %v54_v8, %v88_v42 }
 0x313   :  { %v332_v48 = vpop.permute.xlu1 %331 }
 0x314   :  { %v1804_v49 = vadd.f32 %v332_v48, %v324_v47  ;;  %v59_v47 = vld [vmem:[%s2222_s0 + $0x38] sm:$0xff] }
 0x315   :  { %v82_v48 = vsel %vm60_vm0, %v59_v47, 0.0 }
 0x316   :  { %1574 = vtanh.f32 %v1804_v49 }
 0x323   :  { %v1575_v62 = vpop.eup %1574 }
 0x324   :  { %337 = vrot.lane.b32.xlu1 %v1575_v62, %s1745_s1  ;;  %v104_v62 = vmul.f32 %v96_v45, %v96_v45 }
 0x396   :  { %v338_v4 = vpop.permute.xlu1 %337 }
 0x397   :  { %v340_v5 = vmul.f32 %v338_v4, %v1797_v44  ;;  %v79_v44 = vsel %vm60_vm0, %v58_v40, 0.0  ;;  %v116_v4 = vsel %vm60_vm0, %v104_v62, 0.0 }
 0x399   :  { %342 = vrot.lane.b32.xlu1 %v340_v5, %s1746_s20 }
 0x40b   :  { %v343_v6 = vpop.permute.xlu1 %342 }
 0x40c   :  { %v346_v7 = vsel %vm345_vm4, %v343_v6, 0.0 }
 0x40d   :  { %1490 = vmatmul.mubr.msk.f32.vlgmr.msra.gmra.mxu1 %vm347_vm5, %v346_v7 }
 0x40e   :  { %638 = vmatpush1.msra.mxu1 %v1809_v51  ;;  %685 = vmatprep.mubr.f32.mxu1 %v1747_v3 }
 0x40f   :  { %639 = vmatprep.subr.mxu1 %v1811_v52 }
 0x410   :  { %640 = vmatpush1.msra.mxu1 %v1814_v53 }
 0x411   :  { %641 = vmatprep.subr.mxu1 %v1818_v54 }
 0x412   :  { %642 = vmatpush1.msra.mxu1 %v1822_v55 }
 0x413   :  { %643 = vmatprep.subr.mxu1 %v1826_v56 }
 0x414   :  { %644 = vmatpush1.msra.mxu1 %v1830_v57 }
 0x415   :  { %645 = vmatprep.subr.mxu1 %v1834_v58 }
 0x416   :  { %646 = vmatpush1.msra.mxu1 %v1838_v59 }
 0x417   :  { %647 = vmatprep.subr.mxu1 %v1842_v60 }
 0x418   :  { %648 = vmatpush1.msra.mxu1 %v1846_v61 }
 0x419   :  { %649 = vmatprep.subr.mxu1 %v1850_v63 }
 0x41a   :  { %650 = vmatpush1.msra.mxu1 %v1855_v0 }
 0x41b   :  { %651 = vmatprep.subr.mxu1 %v1858_v1 }
 0x41c   :  { %652 = vmatpush1.msra.mxu1 %v1868_v2 }
 0x41d   :  { %907 = vmatprep.subr.mxu1 %v1807_v50 }
 0x4cd   :  { %v417_v11 = vpop.f32.mrf.mxu1 }
 0x4ce   :  { %v448_v13 = vadd.f32 %v417_v11, %v278_v10 }
 0x4cf   :  { %v419_v14 = vpop.f32.mrf.mxu1 }
 0x4d0   :  { %v1492_v15 = vmul.f32 -1.442695, %v448_v13  ;;  %v422_v16 = vadd.f32 %v419_v14, %v1902_v12 }
 0x4d2   :  { %1576 = vpow2.f32 %v1492_v15  ;;  %v1491_v17 = vmul.f32 -1.442695, %v422_v16 }
 0x4d4   :  { %1578 = vpow2.f32 %v1491_v17 }
 0x4d5   :  { %1580 = vtanh.f32 %v448_v13 }
 0x4df   :  { %v1577_v18 = vpop.eup %1576 }
 0x4e0   :  { %v453_v19 = vadd.f32 1.0, %v1577_v18 }
 0x4e1   :  { %v1579_v20 = vpop.eup %1578 }
 0x4e2   :  { %1582 = vrcp.f32 %v453_v19  ;;  %v427_v21 = vadd.f32 1.0, %v1579_v20  ;;  %v1581_v22 = vpop.eup %1580 }
 0x4e3   :  { %1584 = vtanh.f32 %v422_v16 }
 0x4e4   :  { %1586 = vrcp.f32 %v427_v21 }
 0x4ef   :  { %v1583_v24 = vpop.eup %1582 }
 0x4f0   :  { %v1585_v26 = vpop.eup %1584  ;;  %v1907_v27 = vsel %vm1791_vm3, %v1581_v22, %v1583_v24 }
 0x4f1   :  { %v1587_v28 = vpop.eup %1586  ;;  %459 = vrot.lane.b32.xlu1 %v1907_v27, %s1745_s1  ;;  %v457_v5 = vmul.f32 %v1907_v27, %v1804_v49 }
 0x4f2   :  { %v1913_v29 = vsel %vm1791_vm3, %v1585_v26, %v1587_v28 }
 0x4f3   :  { %433 = vrot.lane.b32.xlu0 %v1913_v29, %s1745_s1 }
 0x512   :  { %74 = vadd.xlane.f32.xlu0 %v73_v31 }
 0x516   :  { %77 = vadd.xlane.f32.xlu0 %v76_v34 }
 0x563   :  { %v460_v36 = vpop.permute.xlu1 %459 }
 0x564   :  { %v462_v37 = vmul.f32 %v460_v36, %v1907_v27 }
 0x565   :  { %v434_v38 = vpop.permute.xlu0 %433 }
 0x566   :  { %v436_v39 = vmul.f32 %v434_v38, %v1913_v29  ;;  %464 = vrot.lane.b32.xlu1 %v462_v37, %s1746_s20  ;;  %v431_v38 = vmul.f32 0.0, %v1913_v29 }
 0x568   :  { %438 = vrot.lane.b32.xlu0 %v436_v39, %s1746_s20 }
 0x587   :  { %80 = vadd.xlane.f32.xlu0 %v79_v44 }
 0x58a   :  { %71 = vadd.xlane.f32.xlu1 %v70_v46 }
 0x58e   :  { %83 = vadd.xlane.f32.xlu1 %v82_v48 }
 0x592   :  { %117 = vadd.xlane.f32.xlu1 %v116_v4 }
 0x59b   :  { %v75_v9 = vpop.xlane.xlu0 %74 }
 0x59c   :  { %v90_v49 = vmul.f32 0.0625, %v75_v9 }
 0x59e   :  { %v98_v17 = vsub.f32 %v56_v30, %v90_v49 }
 0x59f   :  { %v78_v10 = vpop.xlane.xlu0 %77 }
 0x5a0   :  { %v91_v11 = vmul.f32 0.0625, %v78_v10  ;;  %v106_v24 = vmul.f32 %v98_v17, %v98_v17 }
 0x5a2   :  { %v1948_v13 = vsub.f32 %v57_v32, %v91_v11  ;;  %v122_v34 = vsel %vm60_vm0, %v106_v24, 0.0 }
 0x5a4   :  { %v107_v14 = vmul.f32 %v1948_v13, %v1948_v13 }
 0x5a6   :  { %v125_v15 = vsel %vm60_vm0, %v107_v14, 0.0 }
 0x5d8   :  { %v465_v6 = vpop.permute.xlu1 %464 }
 0x5d9   :  { %v1944_v7 = vadd.f32 %v465_v6, %v457_v5 }
 0x5da   :  { %v439_v37 = vpop.permute.xlu0 %438 }
 0x5db   :  { %1588 = vtanh.f32 %v1944_v7  ;;  %v1961_v39 = vadd.f32 %v439_v37, %v431_v38 }
 0x5e8   :  { %v1589_v8 = vpop.eup %1588 }
 0x5e9   :  { %470 = vrot.lane.b32.xlu1 %v1589_v8, %s1745_s1 }
 0x60d   :  { %126 = vadd.xlane.f32.xlu1 %v125_v15 }
 0x610   :  { %v81_v48 = vpop.xlane.xlu0 %80 }
 0x611   :  { %v92_v62 = vmul.f32 0.0625, %v81_v48 }
 0x613   :  { %v72_v16 = vpop.xlane.xlu1 %71  ;;  %v100_v4 = vsub.f32 %v58_v40, %v92_v62 }
 0x614   :  { %v89_v18 = vmul.f32 0.0625, %v72_v16 }
 0x615   :  { %v108_v5 = vmul.f32 %v100_v4, %v100_v4 }
 0x616   :  { %v97_v19 = vsub.f32 %v55_v43, %v89_v18 }
 0x617   :  { %v84_v20 = vpop.xlane.xlu1 %83  ;;  %v128_v6 = vsel %vm60_vm0, %v108_v5, 0.0 }
 0x618   :  { %v93_v21 = vmul.f32 0.0625, %v84_v20  ;;  %v105_v22 = vmul.f32 %v97_v19, %v97_v19 }
 0x61a   :  { %v1953_v26 = vsub.f32 %v59_v47, %v93_v21  ;;  %v119_v28 = vsel %vm60_vm0, %v105_v22, 0.0 }
 0x61b   :  { %v118_v31 = vpop.xlane.xlu1 %117  ;;  %120 = vadd.xlane.f32.xlu0 %v119_v28 }
 0x61c   :  { %v136_v32 = vmul.f32 0.0625, %v118_v31  ;;  %v109_v35 = vmul.f32 %v1953_v26, %v1953_v26 }
 0x61e   :  { %v144_v36 = vadd.f32 1e-05, %v136_v32  ;;  %v131_v30 = vsel %vm60_vm0, %v109_v35, 0.0 }
 0x61f   :  { %123 = vadd.xlane.f32.xlu0 %v122_v34  ;;  %132 = vadd.xlane.f32.xlu1 %v131_v30 }
 0x620   :  { %1590 = vrsqrt.f32 %v144_v36 }
 0x621   :  { %1592 = vtanh.f32 %v1961_v39 }
 0x62d   :  { %v1591_v42 = vpop.eup %1590 }
 0x62e   :  { %v160_v43 = vmul.f32 %v1591_v42, %v96_v45  ;;  %v1593_v47 = vpop.eup %1592 }
 0x630   :  { %v168_v44 = vmul.f32 %v160_v43, %v1776_v23 }
 0x632   :  { %v176_v46 = vadd.f32 %v168_v44, %v1778_v25 }
 0x634   :  { %1538 = vmatprep.mubr.msk.f32.mxu0 %vm60_vm0, %v176_v46 }
 0x635   :  { %444 = vrot.lane.b32.xlu0 %v1593_v47, %s1745_s1 }
 0x654   :  { %129 = vadd.xlane.f32.xlu0 %v128_v6 }
 0x65b   :  { %v471_v8 = vpop.permute.xlu1 %470 }
 0x65c   :  { %v473_v9 = vmul.f32 %v471_v8, %v1907_v27 }
 0x66a   :  { %475 = vrot.lane.b32.xlu0 %v473_v9, %s1746_s20 }
 0x696   :  { %v127_v45 = vpop.xlane.xlu1 %126 }
 0x697   :  { %v139_v10 = vmul.f32 0.0625, %v127_v45 }
 0x699   :  { %v147_v11 = vadd.f32 1e-05, %v139_v10 }
 0x69b   :  { %1594 = vrsqrt.f32 %v147_v11 }
 0x6a4   :  { %v121_v14 = vpop.xlane.xlu0 %120 }
 0x6a5   :  { %v137_v15 = vmul.f32 0.0625, %v121_v14 }
 0x6a7   :  { %v145_v49 = vadd.f32 1e-05, %v137_v15 }
 0x6a8   :  { %v124_v16 = vpop.xlane.xlu0 %123  ;;  %v1595_v27 = vpop.eup %1594 }
 0x6a9   :  { %1596 = vrsqrt.f32 %v145_v49  ;;  %v138_v18 = vmul.f32 0.0625, %v124_v16  ;;  %v163_v31 = vmul.f32 %v1595_v27, %v1948_v13 }
 0x6ab   :  { %v146_v40 = vadd.f32 1e-05, %v138_v18  ;;  %v171_v36 = vmul.f32 %v163_v31, %v1776_v23 }
 0x6ac   :  { %v445_v20 = vpop.permute.xlu0 %444 }
 0x6ad   :  { %v447_v21 = vmul.f32 %v445_v20, %v1913_v29  ;;  %1598 = vrsqrt.f32 %v146_v40  ;;  %v179_v37 = vadd.f32 %v171_v36, %v1778_v25 }
 0x6af   :  { %479 = vrot.lane.b32.xlu1 %v447_v21, %s1745_s1 }
 0x6b6   :  { %v1597_v22 = vpop.eup %1596 }
 0x6b7   :  { %v161_v24 = vmul.f32 %v1597_v22, %v97_v19  ;;  %v133_v19 = vpop.xlane.xlu1 %132 }
 0x6b8   :  { %v141_v13 = vmul.f32 0.0625, %v133_v19 }
 0x6b9   :  { %v169_v28 = vmul.f32 %v161_v24, %v1776_v23 }
 0x6ba   :  { %v1599_v32 = vpop.eup %1598  ;;  %v149_v38 = vadd.f32 1e-05, %v141_v13 }
 0x6bb   :  { %v177_v34 = vadd.f32 %v169_v28, %v1778_v25  ;;  %v162_v35 = vmul.f32 %v1599_v32, %v98_v17 }
 0x6bc   :  { %1600 = vrsqrt.f32 %v149_v38 }
 0x6bd   :  { %1539 = vmatmul.mubr.msk.f32.gmra.mxu0 %vm60_vm0, %v177_v34  ;;  %v170_v29 = vmul.f32 %v162_v35, %v1776_v23 }
 0x6bf   :  { %v178_v30 = vadd.f32 %v170_v29, %v1778_v25 }
 0x6c1   :  { %1541 = vmatprep.mubr.msk.f32.mxu0 %vm60_vm0, %v178_v30 }
 0x6c2   :  { %1542 = vmatmul.mubr.msk.f32.gmra.mxu0 %vm60_vm0, %v179_v37 }
 0x6c9   :  { %v1601_v44 = vpop.eup %1600 }
 0x6ca   :  { %v165_v46 = vmul.f32 %v1601_v44, %v1953_v26 }
 0x6cc   :  { %v173_v62 = vmul.f32 %v165_v46, %v1776_v23 }
 0x6ce   :  { %v181_v8 = vadd.f32 %v173_v62, %v1778_v25 }
 0x6dd   :  { %v130_v42 = vpop.xlane.xlu0 %129 }
 0x6de   :  { %v140_v17 = vmul.f32 0.0625, %v130_v42 }
 0x6e0   :  { %v148_v43 = vadd.f32 1e-05, %v140_v17 }
 0x6e1   :  { %v476_v9 = vpop.permute.xlu0 %475 }
 0x6e2   :  { %1602 = vrsqrt.f32 %v148_v43 }
 0x6ef   :  { %v1603_v47 = vpop.eup %1602 }
 0x6f0   :  { %v164_v48 = vmul.f32 %v1603_v47, %v100_v4 }
 0x6f2   :  { %v172_v5 = vmul.f32 %v164_v48, %v1776_v23 }
 0x6f4   :  { %v180_v6 = vadd.f32 %v172_v5, %v1778_v25 }
 0x6f6   :  { %1544 = vmatprep.mubr.msk.f32.mxu0 %vm60_vm0, %v180_v6 }
 0x6f7   :  { %1545 = vmatmul.mubr.msk.f32.gmra.mxu0 %vm60_vm0, %v181_v8 }
 0x6f8   :  { %550 = vmatprep.mubr.f32.mxu0 %v1747_v3 }
 0x721   :  { %v480_v45 = vpop.permute.xlu1 %479 }
 0x722   :  { %v482_v26 = vsel %vm345_vm4, %v476_v9, %v480_v45 }
 0x723   :  { %1493 = vmatmul.mubr.msk.f32.vlgmr.msra.gmra.mxu0 %vm347_vm5, %v482_v26 }
 0x724   :  { %773 = vmatpush1.msra.mxu0 %v1809_v51  ;;  %820 = vmatprep.mubr.f32.mxu0 %v1747_v3 }
 0x725   :  { %774 = vmatprep.subr.mxu0 %v1811_v52 }
 0x726   :  { %775 = vmatpush1.msra.mxu0 %v1814_v53 }
 0x727   :  { %776 = vmatprep.subr.mxu0 %v1818_v54 }
 0x728   :  { %777 = vmatpush1.msra.mxu0 %v1822_v55 }
 0x729   :  { %778 = vmatprep.subr.mxu0 %v1826_v56 }
 0x72a   :  { %779 = vmatpush1.msra.mxu0 %v1830_v57 }
 0x72b   :  { %780 = vmatprep.subr.mxu0 %v1834_v58 }
 0x72c   :  { %781 = vmatpush1.msra.mxu0 %v1838_v59 }
 0x72d   :  { %782 = vmatprep.subr.mxu0 %v1842_v60 }
 0x72e   :  { %783 = vmatpush1.msra.mxu0 %v1846_v61 }
 0x72f   :  { %784 = vmatprep.subr.mxu0 %v1850_v63 }
 0x730   :  { %785 = vmatpush1.msra.mxu0 %v1855_v0 }
 0x731   :  { %786 = vmatprep.subr.mxu0 %v1858_v1 }
 0x732   :  { %787 = vmatpush1.msra.mxu0 %v1868_v2 }
 0x733   :  { %1042 = vmatprep.subr.mxu0 %v1807_v50 }
 0x77d   :  { %v2010_v23 = vpop.f32.mrf.mxu0 }
 0x77e   :  { %v288_v45 = vadd.f32 %v2010_v23, %v1788_v33 }
 0x77f   :  { %v282_v25 = vpop.f32.mrf.mxu0 }
 0x780   :  { %v283_v15 = vadd.f32 %v282_v25, %v1788_v33 }
 0x782   :  { %v2012_v4 = vpop.f32.mrf.mxu0 }
 0x784   :  { %v2014_v10 = vpop.f32.mrf.mxu0 }
 0x7b7   :  { %v2016_v11 = vpop.f32.mrf.mxu0 }
 0x7b9   :  { %v2018_v14 = vpop.f32.mrf.mxu0 }
 0x7e3   :  { %v552_v49 = vpop.f32.mrf.mxu0 }
 0x7e4   :  { %v583_v16 = vadd.f32 %v552_v49, %v283_v15 }
 0x7e5   :  { %v554_v18 = vpop.f32.mrf.mxu0 }
 0x7e6   :  { %v1495_v40 = vmul.f32 -1.442695, %v583_v16  ;;  %v557_v20 = vadd.f32 %v554_v18, %v1902_v12 }
 0x7e8   :  { %1604 = vpow2.f32 %v1495_v40  ;;  %v1494_v21 = vmul.f32 -1.442695, %v557_v20 }
 0x7ea   :  { %1606 = vpow2.f32 %v1494_v21 }
 0x7eb   :  { %1608 = vtanh.f32 %v557_v20 }
 0x7f5   :  { %v1605_v27 = vpop.eup %1604 }
 0x7f6   :  { %v588_v24 = vadd.f32 1.0, %v1605_v27 }
 0x7f7   :  { %v1607_v22 = vpop.eup %1606 }
 0x7f8   :  { %v562_v28 = vadd.f32 1.0, %v1607_v22  ;;  %v1609_v31 = vpop.eup %1608 }
 0x7fa   :  { %1610 = vrcp.f32 %v562_v28 }
 0x7fb   :  { %1612 = vrcp.f32 %v588_v24 }
 0x7fc   :  { %1614 = vtanh.f32 %v583_v16 }
 0x807   :  { %v1611_v32 = vpop.eup %1610 }
 0x808   :  { %v565_v34 = vsel %vm1791_vm3, %v1609_v31, %v1611_v32  ;;  %v1613_v35 = vpop.eup %1612 }
 0x809   :  { %568 = vrot.lane.b32.xlu1 %v565_v34, %s1745_s1  ;;  %v1615_v36 = vpop.eup %1614  ;;  %v566_v38 = vmul.f32 %v565_v34, %v1961_v39 }
 0x80a   :  { %v591_v29 = vsel %vm1791_vm3, %v1615_v36, %v1613_v35 }
 0x80b   :  { %v592_v43 = vmul.f32 %v591_v29, %v1944_v7 }
 0x80d   :  { %594 = vrot.lane.b32.xlu1 %v591_v29, %s1745_s1 }
 0x87b   :  { %v569_v30 = vpop.permute.xlu1 %568 }
 0x87c   :  { %v571_v37 = vmul.f32 %v569_v30, %v565_v34 }
 0x87e   :  { %573 = vrot.lane.b32.xlu0 %v571_v37, %s1746_s20 }
 0x87f   :  { %v595_v19 = vpop.permute.xlu1 %594 }
 0x880   :  { %v597_v13 = vmul.f32 %v595_v19, %v591_v29 }
 0x882   :  { %599 = vrot.lane.b32.xlu1 %v597_v13, %s1746_s20 }
 0x8f0   :  { %v574_v42 = vpop.permute.xlu0 %573 }
 0x8f1   :  { %v2031_v17 = vadd.f32 %v574_v42, %v566_v38 }
 0x8f3   :  { %1616 = vtanh.f32 %v2031_v17 }
 0x8f4   :  { %v600_v44 = vpop.permute.xlu1 %599 }
 0x8f5   :  { %v2035_v46 = vadd.f32 %v600_v44, %v592_v43 }
 0x8f7   :  { %1618 = vtanh.f32 %v2035_v46 }
 0x900   :  { %v1617_v47 = vpop.eup %1616 }
 0x901   :  { %579 = vrot.lane.b32.xlu0 %v1617_v47, %s1745_s1 }
 0x904   :  { %v1619_v48 = vpop.eup %1618 }
 0x905   :  { %605 = vrot.lane.b32.xlu1 %v1619_v48, %s1745_s1 }
 0x973   :  { %v580_v62 = vpop.permute.xlu0 %579 }
 0x974   :  { %v582_v39 = vmul.f32 %v580_v62, %v565_v34 }
 0x976   :  { %614 = vrot.lane.b32.xlu1 %v582_v39, %s1745_s1 }
 0x977   :  { %v606_v5 = vpop.permute.xlu1 %605 }
 0x978   :  { %v608_v6 = vmul.f32 %v606_v5, %v591_v29 }
 0x97a   :  { %610 = vrot.lane.b32.xlu0 %v608_v6, %s1746_s20  ;;  %v293_v6 = vadd.f32 %v2014_v10, %v1788_v33 }
 0x9e8   :  { %v615_v7 = vpop.permute.xlu1 %614 }
 0x9ec   :  { %v611_v8 = vpop.permute.xlu0 %610 }
 0x9ed   :  { %v617_v9 = vsel %vm345_vm4, %v611_v8, %v615_v7 }
 0x9ee   :  { %1496 = vmatmul.mubr.msk.f32.vlgmr.msra.gmra.mxu1 %vm347_vm5, %v617_v9 }
 0x9ef   :  { %908 = vmatpush1.msra.mxu1 %v1809_v51  ;;  %955 = vmatprep.mubr.f32.mxu1 %v1747_v3 }
 0x9f0   :  { %909 = vmatprep.subr.mxu1 %v1811_v52 }
 0x9f1   :  { %910 = vmatpush1.msra.mxu1 %v1814_v53 }
 0x9f2   :  { %911 = vmatprep.subr.mxu1 %v1818_v54 }
 0x9f3   :  { %912 = vmatpush1.msra.mxu1 %v1822_v55 }
 0x9f4   :  { %913 = vmatprep.subr.mxu1 %v1826_v56 }
 0x9f5   :  { %914 = vmatpush1.msra.mxu1 %v1830_v57 }
 0x9f6   :  { %915 = vmatprep.subr.mxu1 %v1834_v58 }
 0x9f7   :  { %916 = vmatpush1.msra.mxu1 %v1838_v59 }
 0x9f8   :  { %917 = vmatprep.subr.mxu1 %v1842_v60 }
 0x9f9   :  { %918 = vmatpush1.msra.mxu1 %v1846_v61 }
 0x9fa   :  { %919 = vmatprep.subr.mxu1 %v1850_v63 }
 0x9fb   :  { %920 = vmatpush1.msra.mxu1 %v1855_v0 }
 0x9fc   :  { %921 = vmatprep.subr.mxu1 %v1858_v1 }
 0x9fd   :  { %922 = vmatpush1.msra.mxu1 %v1868_v2 }
 0x9fe   :  { %1177 = vmatprep.subr.mxu1 %v1807_v50 }
 0xaae   :  { %v687_v26 = vpop.f32.mrf.mxu1 }
 0xaaf   :  { %v718_v25 = vadd.f32 %v687_v26, %v288_v45 }
 0xab0   :  { %v689_v15 = vpop.f32.mrf.mxu1 }
 0xab1   :  { %v1498_v49 = vmul.f32 -1.442695, %v718_v25  ;;  %v692_v16 = vadd.f32 %v689_v15, %v1902_v12 }
 0xab3   :  { %1620 = vpow2.f32 %v1498_v49  ;;  %v1497_v18 = vmul.f32 -1.442695, %v692_v16 }
 0xab5   :  { %1622 = vpow2.f32 %v1497_v18 }
 0xab6   :  { %1624 = vtanh.f32 %v718_v25 }
 0xac0   :  { %v1621_v40 = vpop.eup %1620 }
 0xac1   :  { %v723_v20 = vadd.f32 1.0, %v1621_v40 }
 0xac2   :  { %v1623_v21 = vpop.eup %1622 }
 0xac3   :  { %1626 = vrcp.f32 %v723_v20  ;;  %v697_v27 = vadd.f32 1.0, %v1623_v21  ;;  %v1625_v22 = vpop.eup %1624 }
 0xac4   :  { %1628 = vtanh.f32 %v692_v16 }
 0xac5   :  { %1630 = vrcp.f32 %v697_v27 }
 0xad0   :  { %v1627_v24 = vpop.eup %1626 }
 0xad1   :  { %v1629_v23 = vpop.eup %1628  ;;  %v726_v28 = vsel %vm1791_vm3, %v1625_v22, %v1627_v24 }
 0xad2   :  { %v1631_v31 = vpop.eup %1630  ;;  %729 = vrot.lane.b32.xlu1 %v726_v28, %s1745_s1  ;;  %v727_v30 = vmul.f32 %v726_v28, %v2035_v46 }
 0xad3   :  { %v700_v32 = vsel %vm1791_vm3, %v1629_v23, %v1631_v31 }
 0xad4   :  { %703 = vrot.lane.b32.xlu0 %v700_v32, %s1745_s1  ;;  %v701_v13 = vmul.f32 %v700_v32, %v2031_v17 }
 0xb44   :  { %v730_v34 = vpop.permute.xlu1 %729 }
 0xb45   :  { %v732_v35 = vmul.f32 %v730_v34, %v726_v28 }
 0xb46   :  { %v704_v36 = vpop.permute.xlu0 %703 }
 0xb47   :  { %v706_v29 = vmul.f32 %v704_v36, %v700_v32  ;;  %734 = vrot.lane.b32.xlu1 %v732_v35, %s1746_s20 }
 0xb49   :  { %708 = vrot.lane.b32.xlu0 %v706_v29, %s1746_s20 }
 0xbb9   :  { %v735_v37 = vpop.permute.xlu1 %734 }
 0xbba   :  { %v2073_v19 = vadd.f32 %v735_v37, %v727_v30 }
 0xbbb   :  { %v709_v38 = vpop.permute.xlu0 %708 }
 0xbbc   :  { %1632 = vtanh.f32 %v2073_v19  ;;  %v2077_v42 = vadd.f32 %v709_v38, %v701_v13 }
 0xbbe   :  { %1634 = vtanh.f32 %v2077_v42 }
 0xbc9   :  { %v1633_v43 = vpop.eup %1632 }
 0xbca   :  { %740 = vrot.lane.b32.xlu1 %v1633_v43, %s1745_s1 }
 0xbcb   :  { %v1635_v44 = vpop.eup %1634 }
 0xbcc   :  { %714 = vrot.lane.b32.xlu0 %v1635_v44, %s1745_s1 }
 0xc3c   :  { %v741_v47 = vpop.permute.xlu1 %740 }
 0xc3d   :  { %v743_v46 = vmul.f32 %v741_v47, %v726_v28 }
 0xc3e   :  { %v715_v48 = vpop.permute.xlu0 %714 }
 0xc3f   :  { %v717_v62 = vmul.f32 %v715_v48, %v700_v32  ;;  %745 = vrot.lane.b32.xlu0 %v743_v46, %s1746_s20 }
 0xc41   :  { %749 = vrot.lane.b32.xlu1 %v717_v62, %s1745_s1 }
 0xcb1   :  { %v746_v17 = vpop.permute.xlu0 %745 }
 0xcb3   :  { %v750_v39 = vpop.permute.xlu1 %749 }
 0xcb4   :  { %v752_v5 = vsel %vm345_vm4, %v746_v17, %v750_v39 }
 0xcb5   :  { %1499 = vmatmul.mubr.msk.f32.vlgmr.msra.gmra.mxu0 %vm347_vm5, %v752_v5 }
 0xcb6   :  { %1043 = vmatpush1.msra.mxu0 %v1809_v51  ;;  %1090 = vmatprep.mubr.f32.mxu0 %v1747_v3 }
 0xcb7   :  { %1044 = vmatprep.subr.mxu0 %v1811_v52 }
 0xcb8   :  { %1045 = vmatpush1.msra.mxu0 %v1814_v53 }
 0xcb9   :  { %1046 = vmatprep.subr.mxu0 %v1818_v54 }
 0xcba   :  { %1047 = vmatpush1.msra.mxu0 %v1822_v55 }
 0xcbb   :  { %1048 = vmatprep.subr.mxu0 %v1826_v56 }
 0xcbc   :  { %1049 = vmatpush1.msra.mxu0 %v1830_v57 }
 0xcbd   :  { %1050 = vmatprep.subr.mxu0 %v1834_v58 }
 0xcbe   :  { %1051 = vmatpush1.msra.mxu0 %v1838_v59 }
 0xcbf   :  { %1052 = vmatprep.subr.mxu0 %v1842_v60 }
 0xcc0   :  { %1053 = vmatpush1.msra.mxu0 %v1846_v61 }
 0xcc1   :  { %1054 = vmatprep.subr.mxu0 %v1850_v63 }
 0xcc2   :  { %1055 = vmatpush1.msra.mxu0 %v1855_v0 }
 0xcc3   :  { %1056 = vmatprep.subr.mxu0 %v1858_v1 }
 0xcc4   :  { %1057 = vmatpush1.msra.mxu0 %v1868_v2 }
 0xcc5   :  { %1312 = vmatprep.subr.mxu0 %v1807_v50 }
 0xd75   :  { %v822_v7 = vpop.f32.mrf.mxu0 }
 0xd76   :  { %v853_v8 = vadd.f32 %v822_v7, %v293_v6 }
 0xd77   :  { %v824_v9 = vpop.f32.mrf.mxu0 }
 0xd78   :  { %v1501_v45 = vmul.f32 -1.442695, %v853_v8  ;;  %v827_v26 = vadd.f32 %v824_v9, %v1902_v12 }
 0xd7a   :  { %1636 = vpow2.f32 %v1501_v45  ;;  %v1500_v25 = vmul.f32 -1.442695, %v827_v26 }
 0xd7c   :  { %1638 = vpow2.f32 %v1500_v25 }
 0xd7d   :  { %1640 = vtanh.f32 %v853_v8 }
 0xd87   :  { %v1637_v15 = vpop.eup %1636 }
 0xd88   :  { %v858_v49 = vadd.f32 1.0, %v1637_v15 }
 0xd89   :  { %v1639_v16 = vpop.eup %1638 }
 0xd8a   :  { %1642 = vrcp.f32 %v858_v49  ;;  %v832_v18 = vadd.f32 1.0, %v1639_v16  ;;  %v1641_v50 = vpop.eup %1640 }
 0xd8b   :  { %1644 = vtanh.f32 %v827_v26 }
 0xd8c   :  { %1646 = vrcp.f32 %v832_v18 }
 0xd97   :  { %v1643_v40 = vpop.eup %1642 }
 0xd98   :  { %v1645_v10 = vpop.eup %1644  ;;  %v861_v20 = vsel %vm1791_vm3, %v1641_v50, %v1643_v40 }
 0xd99   :  { %v1647_v21 = vpop.eup %1646  ;;  %864 = vrot.lane.b32.xlu1 %v861_v20, %s1745_s1  ;;  %v862_v31 = vmul.f32 %v861_v20, %v2073_v19 }
 0xd9a   :  { %v835_v27 = vsel %vm1791_vm3, %v1645_v10, %v1647_v21 }
 0xd9b   :  { %838 = vrot.lane.b32.xlu0 %v835_v27, %s1745_s1  ;;  %v836_v35 = vmul.f32 %v835_v27, %v2077_v42 }
 0xe0b   :  { %v865_v22 = vpop.permute.xlu1 %864 }
 0xe0c   :  { %v867_v24 = vmul.f32 %v865_v22, %v861_v20 }
 0xe0d   :  { %v839_v23 = vpop.permute.xlu0 %838 }
 0xe0e   :  { %v841_v28 = vmul.f32 %v839_v23, %v835_v27  ;;  %869 = vrot.lane.b32.xlu1 %v867_v24, %s1746_s20  ;;  %v1708_v24 = vld [vmem:[#allocation2 + $0xa0] sm:$0xff]  ;;  %v1709_v23 = vld [vmem:[#allocation2 + $0x98] sm:$0xff] }
 0xe10   :  { %843 = vrot.lane.b32.xlu0 %v841_v28, %s1746_s20  ;;  %v1710_v28 = vld [vmem:[#allocation2 + $0x90] sm:$0xff] }
 0xe80   :  { %v870_v32 = vpop.permute.xlu1 %869 }
 0xe81   :  { %v2115_v34 = vadd.f32 %v870_v32, %v862_v31  ;;  %v1711_v31 = vld [vmem:[#allocation2 + $0x88] sm:$0xff]  ;;  %v1712_v32 = vld [vmem:[#allocation2 + $0x80] sm:$0xff] }
 0xe82   :  { %v844_v36 = vpop.permute.xlu0 %843 }
 0xe83   :  { %1648 = vtanh.f32 %v2115_v34  ;;  %v2119_v29 = vadd.f32 %v844_v36, %v836_v35  ;;  %v1714_v35 = vld [vmem:[#allocation2 + $0x70] sm:$0xff]  ;;  %v1715_v36 = vld [vmem:[#allocation2 + $0x68] sm:$0xff] }
 0xe85   :  { %1650 = vtanh.f32 %v2119_v29 }
 0xe90   :  { %v1649_v30 = vpop.eup %1648 }
 0xe91   :  { %875 = vrot.lane.b32.xlu1 %v1649_v30, %s1745_s1  ;;  %v1717_v30 = vld [vmem:[#allocation2 + $0x58] sm:$0xff] }
 0xe92   :  { %v1651_v37 = vpop.eup %1650 }
 0xe93   :  { %849 = vrot.lane.b32.xlu0 %v1651_v37, %s1745_s1 }
 0xf03   :  { %v876_v13 = vpop.permute.xlu1 %875 }
 0xf04   :  { %v878_v19 = vmul.f32 %v876_v13, %v861_v20 }
 0xf05   :  { %v850_v38 = vpop.permute.xlu0 %849 }
 0xf06   :  { %v852_v43 = vmul.f32 %v850_v38, %v835_v27  ;;  %880 = vrot.lane.b32.xlu0 %v878_v19, %s1746_s20 }
 0xf08   :  { %884 = vrot.lane.b32.xlu1 %v852_v43, %s1745_s1 }
 0xf78   :  { %v881_v42 = vpop.permute.xlu0 %880 }
 0xf7a   :  { %v885_v44 = vpop.permute.xlu1 %884 }
 0xf7b   :  { %v887_v47 = vsel %vm345_vm4, %v881_v42, %v885_v44 }
 0xf7c   :  { %1502 = vmatmul.mubr.msk.f32.vlgmr.msra.gmra.mxu1 %vm347_vm5, %v887_v47 }
 0xf7d   :  { %1178 = vmatpush1.msra.mxu1 %v1809_v51  ;;  %1225 = vmatprep.mubr.f32.mxu1 %v1747_v3  ;;  %v298_v51 = vadd.f32 %v2012_v4, %v1788_v33 }
 0xf7e   :  { %1179 = vmatprep.subr.mxu1 %v1811_v52 }
 0xf7f   :  { %1180 = vmatpush1.msra.mxu1 %v1814_v53 }
 0xf80   :  { %1181 = vmatprep.subr.mxu1 %v1818_v54 }
 0xf81   :  { %1182 = vmatpush1.msra.mxu1 %v1822_v55 }
 0xf82   :  { %1183 = vmatprep.subr.mxu1 %v1826_v56 }
 0xf83   :  { %1184 = vmatpush1.msra.mxu1 %v1830_v57 }
 0xf84   :  { %1185 = vmatprep.subr.mxu1 %v1834_v58 }
 0xf85   :  { %1186 = vmatpush1.msra.mxu1 %v1838_v59 }
 0xf86   :  { %1187 = vmatprep.subr.mxu1 %v1842_v60 }
 0xf87   :  { %1188 = vmatpush1.msra.mxu1 %v1846_v61 }
 0xf88   :  { %1189 = vmatprep.subr.mxu1 %v1850_v63 }
 0xf89   :  { %1190 = vmatpush1.msra.mxu1 %v1855_v0 }
 0xf8a   :  { %1191 = vmatprep.subr.mxu1 %v1858_v1 }
 0xf8b   :  { %1192 = vmatpush1.msra.mxu1 %v1868_v2 }
0x103c   :  { %v957_v52 = vpop.f32.mrf.mxu1 }
0x103d   :  { %v988_v53 = vadd.f32 %v957_v52, %v298_v51 }
0x103e   :  { %v959_v54 = vpop.f32.mrf.mxu1 }
0x103f   :  { %v1504_v55 = vmul.f32 -1.442695, %v988_v53  ;;  %v962_v56 = vadd.f32 %v959_v54, %v1902_v12 }
0x1041   :  { %1652 = vpow2.f32 %v1504_v55  ;;  %v1503_v57 = vmul.f32 -1.442695, %v962_v56 }
0x1043   :  { %1654 = vpow2.f32 %v1503_v57 }
0x1044   :  { %1656 = vtanh.f32 %v988_v53 }
0x104e   :  { %v1653_v58 = vpop.eup %1652 }
0x104f   :  { %v993_v59 = vadd.f32 1.0, %v1653_v58 }
0x1050   :  { %v1655_v60 = vpop.eup %1654 }
0x1051   :  { %1658 = vrcp.f32 %v993_v59  ;;  %v967_v46 = vadd.f32 1.0, %v1655_v60  ;;  %v1657_v48 = vpop.eup %1656 }
0x1052   :  { %1660 = vtanh.f32 %v962_v56 }
0x1053   :  { %1662 = vrcp.f32 %v967_v46 }
0x105e   :  { %v1659_v62 = vpop.eup %1658 }
0x105f   :  { %v1661_v33 = vpop.eup %1660  ;;  %v996_v4 = vsel %vm1791_vm3, %v1657_v48, %v1659_v62 }
0x1060   :  { %v1663_v17 = vpop.eup %1662  ;;  %999 = vrot.lane.b32.xlu1 %v996_v4, %s1745_s1  ;;  %v997_v9 = vmul.f32 %v996_v4, %v2115_v34  ;;  %v1713_v34 = vld [vmem:[#allocation2 + $0x78] sm:$0xff] }
0x1061   :  { %v970_v39 = vsel %vm1791_vm3, %v1661_v33, %v1663_v17 }
0x1062   :  { %973 = vrot.lane.b32.xlu0 %v970_v39, %s1745_s1  ;;  %v971_v25 = vmul.f32 %v970_v39, %v2119_v29  ;;  %v1716_v29 = vld [vmem:[#allocation2 + $0x60] sm:$0xff] }
0x10d2   :  { %v1000_v5 = vpop.permute.xlu1 %999 }
0x10d3   :  { %v1002_v6 = vmul.f32 %v1000_v5, %v996_v4 }
0x10d4   :  { %v974_v7 = vpop.permute.xlu0 %973 }
0x10d5   :  { %v976_v8 = vmul.f32 %v974_v7, %v970_v39  ;;  %1004 = vrot.lane.b32.xlu1 %v1002_v6, %s1746_s20 }
0x10d7   :  { %978 = vrot.lane.b32.xlu0 %v976_v8, %s1746_s20 }
0x1147   :  { %v1005_v45 = vpop.permute.xlu1 %1004 }
0x1148   :  { %v2156_v26 = vadd.f32 %v1005_v45, %v997_v9 }
0x1149   :  { %v979_v15 = vpop.permute.xlu0 %978 }
0x114a   :  { %1664 = vtanh.f32 %v2156_v26  ;;  %v2160_v49 = vadd.f32 %v979_v15, %v971_v25 }
0x114c   :  { %1666 = vtanh.f32 %v2160_v49 }
0x1157   :  { %v1665_v16 = vpop.eup %1664 }
0x1158   :  { %1010 = vrot.lane.b32.xlu1 %v1665_v16, %s1745_s1 }
0x1159   :  { %v1667_v18 = vpop.eup %1666 }
0x115a   :  { %984 = vrot.lane.b32.xlu0 %v1667_v18, %s1745_s1 }
0x11ca   :  { %v1011_v50 = vpop.permute.xlu1 %1010 }
0x11cb   :  { %v1013_v40 = vmul.f32 %v1011_v50, %v996_v4 }
0x11cc   :  { %v985_v10 = vpop.permute.xlu0 %984 }
0x11cd   :  { %v987_v20 = vmul.f32 %v985_v10, %v970_v39  ;;  %1015 = vrot.lane.b32.xlu0 %v1013_v40, %s1746_s20 }
0x11cf   :  { %1019 = vrot.lane.b32.xlu1 %v987_v20, %s1745_s1 }
0x123f   :  { %v1016_v21 = vpop.permute.xlu0 %1015 }
0x1241   :  { %v1020_v27 = vpop.permute.xlu1 %1019 }
0x1242   :  { %v1022_v22 = vsel %vm345_vm4, %v1016_v21, %v1020_v27 }
0x1243   :  { %1505 = vmatmul.mubr.msk.f32.vlgmr.msra.gmra.mxu0 %vm347_vm5, %v1022_v22 }
0x1244   :  { %1313 = vmatpush1.msra.mxu0 %v1708_v24  ;;  %1360 = vmatprep.mubr.f32.mxu0 %v1747_v3  ;;  %v1718_v3 = vld [vmem:[#allocation2 + $0x2] ss:$0 sm:$0xff] }
0x1245   :  { %1314 = vmatprep.subr.mxu0 %v1709_v23  ;;  %v303_v37 = vadd.f32 %v1718_v3, %v2018_v14  ;;  %v308_v9 = vadd.f32 %v1718_v3, %v2016_v11 }
0x1246   :  { %1315 = vmatpush1.msra.mxu0 %v1710_v28 }
0x1247   :  { %1316 = vmatprep.subr.mxu0 %v1711_v31 }
0x1248   :  { %1317 = vmatpush1.msra.mxu0 %v1712_v32 }
0x1249   :  { %1318 = vmatprep.subr.mxu0 %v1713_v34 }
0x124a   :  { %1319 = vmatpush1.msra.mxu0 %v1714_v35 }
0x124b   :  { %1320 = vmatprep.subr.mxu0 %v1715_v36 }
0x124c   :  { %1321 = vmatpush1.msra.mxu0 %v1716_v29 }
0x124d   :  { %1322 = vmatprep.subr.mxu0 %v1717_v30 }
0x124e   :  { %1323 = vmatpush1.msra.mxu0 %v1846_v61 }
0x124f   :  { %1324 = vmatprep.subr.mxu0 %v1850_v63 }
0x1250   :  { %1325 = vmatpush1.msra.mxu0 %v1855_v0 }
0x1251   :  { %1326 = vmatprep.subr.mxu0 %v1858_v1 }
0x1252   :  { %1327 = vmatpush1.msra.mxu0 %v1868_v2 }
0x1303   :  { %v1092_v13 = vpop.f32.mrf.mxu0 }
0x1304   :  { %v1123_v19 = vadd.f32 %v1092_v13, %v303_v37 }
0x1305   :  { %v1094_v38 = vpop.f32.mrf.mxu0 }
0x1306   :  { %v1507_v43 = vmul.f32 -1.442695, %v1123_v19  ;;  %v1097_v42 = vadd.f32 %v1094_v38, %v1902_v12 }
0x1308   :  { %1668 = vpow2.f32 %v1507_v43  ;;  %v1506_v44 = vmul.f32 -1.442695, %v1097_v42 }
0x130a   :  { %1670 = vpow2.f32 %v1506_v44 }
0x130b   :  { %1672 = vtanh.f32 %v1123_v19 }
0x1315   :  { %v1669_v61 = vpop.eup %1668 }
0x1316   :  { %v1128_v63 = vadd.f32 1.0, %v1669_v61 }
0x1317   :  { %v1671_v47 = vpop.eup %1670 }
0x1318   :  { %1674 = vrcp.f32 %v1128_v63  ;;  %v1102_v0 = vadd.f32 1.0, %v1671_v47  ;;  %v1673_v1 = vpop.eup %1672 }
0x1319   :  { %1676 = vtanh.f32 %v1097_v42 }
0x131a   :  { %1678 = vrcp.f32 %v1102_v0 }
0x1325   :  { %v1675_v2 = vpop.eup %1674 }
0x1326   :  { %v1677_v14 = vpop.eup %1676  ;;  %v1131_v51 = vsel %vm1791_vm3, %v1673_v1, %v1675_v2 }
0x1327   :  { %v1679_v52 = vpop.eup %1678  ;;  %1134 = vrot.lane.b32.xlu1 %v1131_v51, %s1745_s1  ;;  %v1132_v57 = vmul.f32 %v1131_v51, %v2156_v26 }
0x1328   :  { %v1105_v12 = vsel %vm1791_vm3, %v1677_v14, %v1679_v52 }
0x1329   :  { %1108 = vrot.lane.b32.xlu0 %v1105_v12, %s1745_s1  ;;  %v1106_v60 = vmul.f32 %v1105_v12, %v2160_v49  ;;  %v1719_v49 = vld [vmem:[#allocation2 + $0xa] ss:$0 sm:$0xff] }
0x1399   :  { %v1135_v53 = vpop.permute.xlu1 %1134 }
0x139a   :  { %v1137_v54 = vmul.f32 %v1135_v53, %v1131_v51 }
0x139b   :  { %v1109_v55 = vpop.permute.xlu0 %1108 }
0x139c   :  { %v1111_v56 = vmul.f32 %v1109_v55, %v1105_v12  ;;  %1139 = vrot.lane.b32.xlu1 %v1137_v54, %s1746_s20 }
0x139e   :  { %1113 = vrot.lane.b32.xlu0 %v1111_v56, %s1746_s20 }
0x140e   :  { %v1140_v58 = vpop.permute.xlu1 %1139 }
0x140f   :  { %v1142_v59 = vadd.f32 %v1140_v58, %v1132_v57 }
0x1410   :  { %v1114_v46 = vpop.permute.xlu0 %1113 }
0x1411   :  { %1680 = vtanh.f32 %v1142_v59  ;;  %v1116_v48 = vadd.f32 %v1114_v46, %v1106_v60  ;;  %v51_v60 = vld [vmem:[#allocation2 + $0xe0] sm:$0xff]  ;;  %v50_v46 = vld [vmem:[#allocation2 + $0xd0] sm:$0xff] }
0x1412   :  { %1547 = vmatprep.subr.mxu1 %v51_v60 }
0x1413   :  { %1682 = vtanh.f32 %v1116_v48 }
0x141e   :  { %v1681_v62 = vpop.eup %1680 }
0x141f   :  { %1145 = vrot.lane.b32.xlu1 %v1681_v62, %s1745_s1  ;;  %v48_v62 = vld [vmem:[#allocation2 + $0xb0] sm:$0xff] }
0x1420   :  { %v1683_v33 = vpop.eup %1682 }
0x1421   :  { %1119 = vrot.lane.b32.xlu0 %v1683_v33, %s1745_s1 }
0x1491   :  { %v1146_v4 = vpop.permute.xlu1 %1145 }
0x1492   :  { %v1148_v17 = vmul.f32 %v1146_v4, %v1131_v51 }
0x1493   :  { %v1120_v39 = vpop.permute.xlu0 %1119 }
0x1494   :  { %v1122_v5 = vmul.f32 %v1120_v39, %v1105_v12  ;;  %1150 = vrot.lane.b32.xlu0 %v1148_v17, %s1746_s20  ;;  %v29_v39 = vld [vmem:[#allocation2 + $0x3] ss:$0 sm:$0xff] }
0x1496   :  { %1154 = vrot.lane.b32.xlu1 %v1122_v5, %s1745_s1 }
0x1506   :  { %v1151_v6 = vpop.permute.xlu0 %1150 }
0x1508   :  { %v1155_v7 = vpop.permute.xlu1 %1154 }
0x1509   :  { %v1157_v8 = vsel %vm345_vm4, %v1151_v6, %v1155_v7 }
0x150a   :  { %1508 = vmatmul.mubr.msk.f32.vlgmr.msra.gmra.mxu1 %vm347_vm5, %v1157_v8 }
0x150b   :  { %1548 = vmatpush3.msra.mxu1 %v51_v60 }
0x150c   :  { %1549 = vmatprep.subr.mxu1 %v50_v46 }
0x150d   :  { %1550 = vmatpush3.msra.mxu1 %v50_v46 }
0x15ca   :  { %v1227_v45 = vpop.f32.mrf.mxu1 }
0x15cb   :  { %v1258_v26 = vadd.f32 %v1227_v45, %v308_v9 }
0x15cc   :  { %v1229_v25 = vpop.f32.mrf.mxu1 }
0x15cd   :  { %v1510_v15 = vmul.f32 -1.442695, %v1258_v26  ;;  %v1232_v16 = vadd.f32 %v1719_v49, %v1229_v25 }
0x15cf   :  { %1684 = vpow2.f32 %v1510_v15  ;;  %v1509_v18 = vmul.f32 -1.442695, %v1232_v16 }
0x15d1   :  { %1686 = vpow2.f32 %v1509_v18 }
0x15d2   :  { %1688 = vtanh.f32 %v1258_v26 }
0x15dc   :  { %v1685_v50 = vpop.eup %1684 }
0x15dd   :  { %v1263_v40 = vadd.f32 1.0, %v1685_v50 }
0x15de   :  { %v1687_v10 = vpop.eup %1686 }
0x15df   :  { %1690 = vrcp.f32 %v1263_v40  ;;  %v1237_v20 = vadd.f32 1.0, %v1687_v10  ;;  %v1689_v21 = vpop.eup %1688 }
0x15e0   :  { %1692 = vtanh.f32 %v1232_v16 }
0x15e1   :  { %1694 = vrcp.f32 %v1237_v20 }
0x15ec   :  { %v1691_v27 = vpop.eup %1690 }
0x15ed   :  { %v1693_v11 = vpop.eup %1692  ;;  %v1266_v22 = vsel %vm1791_vm3, %v1689_v21, %v1691_v27 }
0x15ee   :  { %v1695_v24 = vpop.eup %1694  ;;  %1269 = vrot.lane.b32.xlu1 %v1266_v22, %s1745_s1  ;;  %v1267_v35 = vmul.f32 %v1266_v22, %v1142_v59 }
0x15ef   :  { %v1240_v23 = vsel %vm1791_vm3, %v1693_v11, %v1695_v24 }
0x15f0   :  { %1243 = vrot.lane.b32.xlu0 %v1240_v23, %s1745_s1  ;;  %v1241_v30 = vmul.f32 %v1240_v23, %v1116_v48  ;;  %v49_v48 = vld [vmem:[#allocation2 + $0xc0] sm:$0xff] }
0x15f1   :  { %1551 = vmatprep.subr.mxu1 %v49_v48 }
0x15f2   :  { %1552 = vmatpush3.msra.mxu1 %v49_v48 }
0x15f3   :  { %1553 = vmatprep.subr.mxu1 %v48_v62 }
0x15f4   :  { %1554 = vmatpush3.msra.mxu1 %v48_v62 }
0x1660   :  { %v1270_v28 = vpop.permute.xlu1 %1269 }
0x1661   :  { %v1272_v31 = vmul.f32 %v1270_v28, %v1266_v22 }
0x1662   :  { %v1244_v32 = vpop.permute.xlu0 %1243 }
0x1663   :  { %v1246_v34 = vmul.f32 %v1244_v32, %v1240_v23  ;;  %1274 = vrot.lane.b32.xlu1 %v1272_v31, %s1746_s20 }
0x1665   :  { %1248 = vrot.lane.b32.xlu0 %v1246_v34, %s1746_s20 }
0x16d5   :  { %v1275_v36 = vpop.permute.xlu1 %1274 }
0x16d6   :  { %v1277_v29 = vadd.f32 %v1275_v36, %v1267_v35 }
0x16d7   :  { %v1249_v3 = vpop.permute.xlu0 %1248 }
0x16d8   :  { %1696 = vtanh.f32 %v1277_v29  ;;  %v1251_v37 = vadd.f32 %v1249_v3, %v1241_v30 }
0x16da   :  { %1698 = vtanh.f32 %v1251_v37 }
0x16e5   :  { %v1697_v13 = vpop.eup %1696 }
0x16e6   :  { %1280 = vrot.lane.b32.xlu1 %v1697_v13, %s1745_s1 }
0x16e7   :  { %v1699_v19 = vpop.eup %1698 }
0x16e8   :  { %1254 = vrot.lane.b32.xlu0 %v1699_v19, %s1745_s1 }
0x1758   :  { %v1281_v38 = vpop.permute.xlu1 %1280 }
0x1759   :  { %v1283_v43 = vmul.f32 %v1281_v38, %v1266_v22 }
0x175a   :  { %v1255_v42 = vpop.permute.xlu0 %1254 }
0x175b   :  { %v1257_v44 = vmul.f32 %v1255_v42, %v1240_v23  ;;  %1285 = vrot.lane.b32.xlu0 %v1283_v43, %s1746_s20 }
0x175d   :  { %1289 = vrot.lane.b32.xlu1 %v1257_v44, %s1745_s1 }
0x17cd   :  { %v1286_v61 = vpop.permute.xlu0 %1285 }
0x17ce   :  { %1555 = vmatprep.mubr.msk.f32.mxu1 %vm345_vm4, %v1286_v61 }
0x17cf   :  { %v1290_v63 = vpop.permute.xlu1 %1289 }
0x17d0   :  { %v1292_v47 = vsel %vm345_vm4, %v1286_v61, %v1290_v63 }
0x17d1   :  { %1511 = vmatmul.mubr.msk.f32.vlgmr.msra.gmra.mxu0 %vm347_vm5, %v1292_v47 }
0x1891   :  { %v1362_v0 = vpop.f32.mrf.mxu0 }
0x1893   :  { %v1363_v1 = vpop.f32.mrf.mxu0 }
0x1894   :  { %v1366_v2 = vadd.f32 %v1719_v49, %v1363_v1 }
0x1896   :  { %v1512_v14 = vmul.f32 -1.442695, %v1366_v2 }
0x1898   :  { %1700 = vpow2.f32 %v1512_v14 }
0x1899   :  { %1702 = vtanh.f32 %v1366_v2 }
0x18a5   :  { %v1701_v51 = vpop.eup %1700 }
0x18a6   :  { %v1371_v52 = vadd.f32 1.0, %v1701_v51  ;;  %v1703_v12 = vpop.eup %1702 }
0x18a8   :  { %1704 = vrcp.f32 %v1371_v52 }
0x18b5   :  { %v1705_v53 = vpop.eup %1704 }
0x18b6   :  { %v1374_v54 = vsel %vm1791_vm3, %v1703_v12, %v1705_v53 }
0x18b7   :  { %1377 = vrot.lane.b32.xlu0 %v1374_v54, %s1745_s1  ;;  %v1375_v57 = vmul.f32 %v1374_v54, %v1251_v37 }
0x1929   :  { %v1378_v55 = vpop.permute.xlu0 %1377 }
0x192a   :  { %v1380_v56 = vmul.f32 %v1378_v55, %v1374_v54 }
0x192c   :  { %1382 = vrot.lane.b32.xlu1 %v1380_v56, %s1746_s20 }
0x199e   :  { %v1383_v58 = vpop.permute.xlu1 %1382 }
0x199f   :  { %v1385_v59 = vadd.f32 %v1383_v58, %v1375_v57 }
0x19a1   :  { %1706 = vtanh.f32 %v1385_v59 }
0x19ae   :  { %v1707_v41 = vpop.eup %1706 }
0x19af   :  { %1388 = vrot.lane.b32.xlu0 %v1707_v41, %s1745_s1 }
0x1a21   :  { %v1389_v33 = vpop.permute.xlu0 %1388 }
0x1a22   :  { %v1391_v4 = vmul.f32 %v1389_v33, %v1374_v54 }
0x1a24   :  { %1393 = vrot.lane.b32.xlu1 %v1391_v4, %s1746_s20 }
0x1a96   :  { %v1394_v17 = vpop.permute.xlu1 %1393 }
0x1a97   :  { %1556 = vmatmul.mubr.msk.f32.vlgmr.msra.gmra.mxu1 %vm345_vm4, %v1394_v17 }
0x1b57   :  { %v1557_v5 = vpop.f32.mrf.mxu1 }
0x1b58   :  { %v1471_v6 = vadd.f32 %v1557_v5, %v29_v39 }
0x1b59   :  { %v1465_v7 = vpop.f32.mrf.mxu1 }
0x1b5a   :  { %1475 = vst [vmem:[%s2224_s2 + $0x8] sm:$0xff] %v1471_v6  ;;  %v1466_v8 = vadd.f32 %v1465_v7, %v29_v39 }
0x1b5c   :  { %1474 = vst [vmem:[%s2224_s2] sm:$0xff] %v1466_v8 }
0x1b5d   :  { %1480 = vsyncpa [#allocation3], 1 }

</bundles_post_ra>
